<compile_context>
chip_gen: v6e
topology: v6e:2x2x1
jax: 0.10.0
libtpu: 0.0.40
codegen_flags: <defaults>
</compile_context>

<pallas_src>
import jax
import jax.numpy as jnp
from jax.experimental import pallas as pl
from jax.experimental.pallas import tpu as pltpu


# ----------------------------------------------------------------------------
# small helpers
# ----------------------------------------------------------------------------
def _round_up(x, m):
    return ((x + m - 1) // m) * m


def _vmem_budget_bytes():
    # Conservative default sized for v7x's 64 MiB physical VMEM; refined upward
    # when the runtime reports a larger capacity (v5e/v6e: 128 MiB).
    cap = 64 * 1024 * 1024
    try:
        cap = int(pltpu.get_tpu_info().vmem_capacity_bytes)
    except Exception:
        pass
    return int(cap * 0.70)


# ----------------------------------------------------------------------------
# in-kernel helpers
# ----------------------------------------------------------------------------
def _circ_conv(x, w_ref, b_ref, *, dilation, ks):
    """Circular dilated conv1d as one wide-K MXU matmul.

    x:     (Bt, L, Cin) f32 value resident in VMEM/vregs
    w_ref: (ks*Cin, N)  bf16 ref — taps concatenated tap-major along rows
    b_ref: (1, N)       f32 ref
    returns (Bt, L, N)  f32 (pre-activation)

    y[b, l] = sum_k x[b, (l + dil*(k - center)) % L] @ W[k]
    (torch Conv1d cross-correlation with circular 'same' padding; center
    assumes odd kernel_size).
    """
    bt, seq, cin = x.shape
    center = (ks - 1) // 2
    xb = x.astype(jnp.bfloat16)                          # single bf16 cast of the input
    if ks == 1:
        xcat = xb
    else:
        parts = []
        for k in range(ks):
            s = (dilation * (k - center)) % seq
            if s == 0:
                parts.append(xb)
            else:
                # static circular shift: result[:, i] = xb[:, (i + s) % L]
                parts.append(jnp.concatenate([xb[:, s:, :], xb[:, :s, :]], axis=1))
        xcat = jnp.concatenate(parts, axis=-1)           # (Bt, L, ks*Cin)
    nout = w_ref.shape[-1]
    y = jnp.dot(xcat.reshape(bt * seq, ks * cin), w_ref[...],
                preferred_element_type=jnp.float32)      # MXU, f32 accumulate
    y = y + b_ref[...]                                   # f32 epilogue
    return y.reshape(bt, seq, nout)


def _build_model_kernel(plan):
    """Fused kernel for the encoder + decoder RevolutionLayer stacks.

    plan: static per-layer dicts {dilation, ks, has_proj, ffn, cout}.
    Ref order: x, then 4 refs per layer [w1c, b1c, w2, b2], then out.
    The 1x1 residual projection is pre-fused into w1c along N (columns
    [ffn : ffn+cout]), so one dot per layer produces both h_pre and res.
    """
    def kernel(x_ref, *refs):
        out_ref = refs[-1]
        wrefs = refs[:-1]
        x = x_ref[...].astype(jnp.float32)               # (Bt, L, C0)
        for li, lyr in enumerate(plan):
            w1c, b1c, w2, b2 = wrefs[4 * li:4 * li + 4]
            dil, ks = lyr["dilation"], lyr["ks"]
            ffn, cout = lyr["ffn"], lyr["cout"]
            y1 = _circ_conv(x, w1c, b1c, dilation=dil, ks=ks)  # (Bt, L, ffn[+cout])
            h = jnp.maximum(y1[..., :ffn], 0.0)
            if lyr["has_proj"]:
                res = y1[..., ffn:]                      # fused 1x1 projection
            elif x.shape[-1] == cout:
                res = x                                  # identity residual
            else:
                # identity residual feeding a lane-padded (last) layer
                pad = jnp.zeros(x.shape[:-1] + (cout - x.shape[-1],), x.dtype)
                res = jnp.concatenate([x, pad], axis=-1)
            x = jnp.maximum(_circ_conv(h, w2, b2, dilation=dil, ks=ks) + res, 0.0)
        out_ref[...] = x.astype(out_ref.dtype)

    return kernel


# ----------------------------------------------------------------------------
# tile selection (VMEM-budget driven)
# ----------------------------------------------------------------------------
def _live_row_bytes(plan, c0, cout_last):
    """Conservative per-(Bt*L)-row live VMEM bytes inside the kernel body,
    plus the double-buffered input/output block bytes."""
    worst = 0
    cin = c0
    for lyr in plan:
        ks, ffn, cout = lyr["ks"], lyr["ffn"], lyr["cout"]
        n1 = ffn + (cout if lyr["has_proj"] else 0)
        live = (cin * 4              # x (f32)
                + ks * cin * 2       # xcat (bf16)
                + n1 * 4             # conv1(+proj) output (f32)
                + ffn * 4            # h (f32)
                + ks * ffn * 2       # h taps (bf16)
                + 2 * cout * 4)      # conv2 out + res / next x (f32)
        worst = max(worst, live)
        cin = cout
    # double-buffered in/out blocks
    return worst + 2 * 4 * c0 + 2 * 4 * cout_last


def _pick_batch_tile(batch, length, row_bytes, weight_bytes, budget,
                     target_rows=8192):
    """Largest divisor of `batch` that (a) keeps >= 2 grid steps when possible
    (v7x has 2 TensorCores/chip), (b) fits the VMEM budget, and (c) keeps
    Bt*L rows within a DMA/MXU-friendly target."""
    best = 1
    for bt in range(1, batch + 1):
        if batch % bt:
            continue
        if batch > 1 and batch // bt < 2:
            continue
        if bt * length * row_bytes + weight_bytes > budget:
            continue
        if bt * length > max(target_rows, length):
            continue
        best = bt
    return best


# ----------------------------------------------------------------------------
# wrapper: single pallas_call for the full model
# ----------------------------------------------------------------------------
def _prep_layer(p, cin, dilation, cout_pad):
    """Fuse the 1x1 residual projection into conv1 along N and (for the last
    layer) zero-pad conv2's output columns so the kernel's store is lane-dense.
    Returns ([w1c, b1c, w2, b2], plan_entry)."""
    w1, b1, w2, b2, wr, br = p["w1"], p["b1"], p["w2"], p["b2"], p["wr"], p["br"]
    ks = w1.shape[0] // cin
    ffn = w1.shape[-1]
    cout = w2.shape[-1]
    if cout_pad > cout:
        w2 = jnp.pad(w2, ((0, 0), (0, cout_pad - cout)))
        b2 = jnp.pad(b2, ((0, 0), (0, cout_pad - cout)))
    if wr is not None:
        center = (ks - 1) // 2
        wr_full = jnp.zeros((ks * cin, cout_pad), w1.dtype)
        wr_full = wr_full.at[center * cin:(center + 1) * cin, :cout].set(wr)
        br_full = jnp.pad(br, ((0, 0), (0, cout_pad - cout)))
        w1c = jnp.concatenate([w1, wr_full], axis=-1)    # (ks*cin, ffn + cout_pad)
        b1c = jnp.concatenate([b1, br_full], axis=-1)
    else:
        w1c, b1c = w1, b1
    entry = {"dilation": dilation, "ks": ks, "has_proj": wr is not None,
             "ffn": ffn, "cout": cout_pad}
    return [w1c, b1c, w2, b2], entry


def _model_forward(params, input_seq):
    # PyTorch: x.float(); permute -> encoder -> decoder -> permute back.
    # Channels-last kernels make both permutes identity; both stacks are fused
    # into ONE pallas_call so the (B, L, hdim1) intermediate never hits HBM.
    x = input_seq.astype(jnp.float32)
    B, L, c0 = x.shape
    dim_out = params["decoder"][-1]["w2"].shape[-1]
    cout_pad = _round_up(dim_out, 128)                    # lane-dense output store

    plan, weight_args = [], []
    cin = c0
    stacks = (params["encoder"], params["decoder"])
    n_total = sum(len(s) for s in stacks)
    n_done = 0
    for stack in stacks:
        for i, p in enumerate(stack):
            n_done += 1
            is_last = (n_done == n_total)
            cout_nat = p["w2"].shape[-1]
            pad_to = cout_pad if is_last else cout_nat
            wlist, entry = _prep_layer(p, cin, 2 ** i, pad_to)
            plan.append(entry)
            weight_args += wlist
            cin = cout_nat

    weight_bytes = sum(int(a.size) * a.dtype.itemsize for a in weight_args)
    row_bytes = _live_row_bytes(plan, c0, cout_pad)
    budget = _vmem_budget_bytes()
    bt = _pick_batch_tile(B, L, row_bytes, weight_bytes, budget)
    grid = (B // bt,)

    need = bt * L * row_bytes + weight_bytes
    vmem_limit = int(min(100 << 20, max(2 * need + (8 << 20), 48 << 20)))

    flops = 2 * B * L * sum(int(w.shape[0]) * int(w.shape[1])
                            for w in (weight_args[0::4] + weight_args[2::4]))
    bytes_accessed = int(x.size) * 4 + B * L * cout_pad * 4 + weight_bytes

    in_specs = [pl.BlockSpec((bt, L, c0), lambda i: (i, 0, 0))]
    for a in weight_args:
        # Resident weights: constant index map, fetched once, single-buffered.
        in_specs.append(pl.BlockSpec(a.shape, lambda i: (0, 0),
                                     pipeline_mode=pl.Buffered(1)))

    out = pl.pallas_call(
        _build_model_kernel(plan),
        out_shape=jax.ShapeDtypeStruct((B, L, cout_pad), jnp.float32),
        grid=grid,
        in_specs=in_specs,
        out_specs=pl.BlockSpec((bt, L, cout_pad), lambda i: (i, 0, 0)),
        compiler_params=pltpu.CompilerParams(
            dimension_semantics=("parallel",),
            vmem_limit_bytes=vmem_limit),
        cost_estimate=pl.CostEstimate(
            flops=int(flops), transcendentals=0,
            bytes_accessed=int(bytes_accessed)),
    )(x, *weight_args)

    return out[..., :dim_out] if cout_pad != dim_out else out


model4pretrain_apply = jax.jit(_model_forward)


# ----------------------------------------------------------------------------
# parameters (deterministic init mirroring torch Conv1d default uniform init;
# conv weights stored pre-reshaped to (ks*Cin, Cout) in bf16 for the MXU).
# ----------------------------------------------------------------------------
def _init_conv(key, ks, c_in, c_out):
    kw, kb = jax.random.split(key)
    bound = (c_in * ks) ** -0.5
    w = jax.random.uniform(kw, (ks, c_in, c_out), jnp.float32, -bound, bound)
    b = jax.random.uniform(kb, (c_out,), jnp.float32, -bound, bound)
    return (w.reshape(ks * c_in, c_out).astype(jnp.bfloat16),
            b.reshape(1, c_out).astype(jnp.float32))


def revolution_layer_init(key, c_in, hidden_list, ffn_dim, ks):
    params = []
    prev = c_in
    for c_out in hidden_list:
        key, k1, k2, k3 = jax.random.split(key, 4)
        w1, b1 = _init_conv(k1, ks, prev, ffn_dim)
        w2, b2 = _init_conv(k2, ks, ffn_dim, c_out)
        if prev != c_out:
            wr, br = _init_conv(k3, 1, prev, c_out)
        else:
            wr, br = None, None
        params.append({"w1": w1, "b1": b1, "w2": w2, "b2": b2, "wr": wr, "br": br})
        prev = c_out
    return params


def model4pretrain_init(key, cfg):
    k_enc, k_dec = jax.random.split(key)
    enc = revolution_layer_init(k_enc, cfg["dim"],
                                [cfg["hdim1"]] * cfg["n_layers"],
                                cfg["hdim1"] * 2, cfg["kernel_size"])
    dec_hidden = [cfg["hdim2"]] * cfg["n_layers"]
    dec_hidden[-1] = cfg["dim"]
    dec = revolution_layer_init(k_dec, cfg["hdim1"], dec_hidden,
                                cfg["hdim2"] * 2, cfg["kernel_size"])
    return {"encoder": enc, "decoder": dec}


# ----------------------------------------------------------------------------
# pure-JAX reference (same math: bf16 matmul operands, f32 accumulate/epilogue,
# f32 activations carried between layers) for correctness checking.
# NOTE: bf16 dot operands deviate from the PyTorch f32 path by design.
# ----------------------------------------------------------------------------
def _circ_conv_ref(x, w_cat, b, dilation, ks):
    B, L, cin = x.shape
    center = (ks - 1) // 2
    xb = x.astype(jnp.bfloat16)
    if ks == 1:
        xcat = xb
    else:
        xcat = jnp.concatenate(
            [jnp.roll(xb, -dilation * (k - center), axis=1) for k in range(ks)],
            axis=-1)
    y = jnp.dot(xcat.reshape(B * L, ks * cin), w_cat,
                preferred_element_type=jnp.float32) + b
    return y.reshape(B, L, -1)


def _model_ref(params, input_seq):
    x = input_seq.astype(jnp.float32)
    for stack in (params["encoder"], params["decoder"]):
        for i, p in enumerate(stack):
            dil = 2 ** i
            ks = p["w1"].shape[0] // x.shape[-1]
            h = jnp.maximum(_circ_conv_ref(x, p["w1"], p["b1"], dil, ks), 0.0)
            res = x if p["wr"] is None else _circ_conv_ref(x, p["wr"], p["br"], 1, 1)
            x = jnp.maximum(_circ_conv_ref(h, p["w2"], p["b2"], dil, ks) + res, 0.0)
    return x


# ----------------------------------------------------------------------------
if __name__ == "__main__":
    cfg = {"dim": 32, "hdim1": 64, "hdim2": 64, "n_layers": 2, "kernel_size": 3}
    B, L = 2, 16

    key = jax.random.PRNGKey(0)
    k_params, k_x = jax.random.split(key)
    params = model4pretrain_init(k_params, cfg)
    input_seq = jax.random.normal(k_x, (B, L, cfg["dim"]), jnp.float32)

    out = jax.block_until_ready(model4pretrain_apply(params, input_seq))
    assert out.shape == (B, L, cfg["dim"]), out.shape
    assert out.dtype == jnp.float32

    ref = _model_ref(params, input_seq)
    max_err = float(jnp.max(jnp.abs(out - ref)))
    assert max_err < 5e-2, f"mismatch vs reference: {max_err}"

    print("KERNEL_OK")
</pallas_src>

<mosaic_0001>
module attributes {stable_mosaic.version = 11 : i64} {
  func.func @kernel(%arg0: i32, %arg1: memref<1x16x32xf32, #tpu.memory_space<vmem>>, %arg2: memref<96x192xbf16, #tpu.memory_space<vmem>>, %arg3: memref<1x192xf32, #tpu.memory_space<vmem>>, %arg4: memref<384x64xbf16, #tpu.memory_space<vmem>>, %arg5: memref<1x64xf32, #tpu.memory_space<vmem>>, %arg6: memref<192x128xbf16, #tpu.memory_space<vmem>>, %arg7: memref<1x128xf32, #tpu.memory_space<vmem>>, %arg8: memref<384x64xbf16, #tpu.memory_space<vmem>>, %arg9: memref<1x64xf32, #tpu.memory_space<vmem>>, %arg10: memref<192x128xbf16, #tpu.memory_space<vmem>>, %arg11: memref<1x128xf32, #tpu.memory_space<vmem>>, %arg12: memref<384x64xbf16, #tpu.memory_space<vmem>>, %arg13: memref<1x64xf32, #tpu.memory_space<vmem>>, %arg14: memref<192x256xbf16, #tpu.memory_space<vmem>>, %arg15: memref<1x256xf32, #tpu.memory_space<vmem>>, %arg16: memref<384x128xbf16, #tpu.memory_space<vmem>>, %arg17: memref<1x128xf32, #tpu.memory_space<vmem>>, %arg18: memref<1x16x128xf32, #tpu.memory_space<vmem>>) attributes {dimension_semantics = [#tpu.dimension_semantics<parallel>], iteration_bounds = array<i64: 2>, scalar_prefetch = 0 : i64, scratch_operands = 0 : i64, tpu.core_type = #tpu.core_type<tc>, window_params = [{transform_indices = @transform_0, window_bounds = array<i64: 1, 16, 32>}, {pipeline_mode = #tpu.pipeline_mode<synchronous>, transform_indices = @transform_1, window_bounds = array<i64: 96, 192>}, {pipeline_mode = #tpu.pipeline_mode<synchronous>, transform_indices = @transform_2, window_bounds = array<i64: 1, 192>}, {pipeline_mode = #tpu.pipeline_mode<synchronous>, transform_indices = @transform_3, window_bounds = array<i64: 384, 64>}, {pipeline_mode = #tpu.pipeline_mode<synchronous>, transform_indices = @transform_4, window_bounds = array<i64: 1, 64>}, {pipeline_mode = #tpu.pipeline_mode<synchronous>, transform_indices = @transform_5, window_bounds = array<i64: 192, 128>}, {pipeline_mode = #tpu.pipeline_mode<synchronous>, transform_indices = @transform_6, window_bounds = array<i64: 1, 128>}, {pipeline_mode = #tpu.pipeline_mode<synchronous>, transform_indices = @transform_7, window_bounds = array<i64: 384, 64>}, {pipeline_mode = #tpu.pipeline_mode<synchronous>, transform_indices = @transform_8, window_bounds = array<i64: 1, 64>}, {pipeline_mode = #tpu.pipeline_mode<synchronous>, transform_indices = @transform_9, window_bounds = array<i64: 192, 128>}, {pipeline_mode = #tpu.pipeline_mode<synchronous>, transform_indices = @transform_10, window_bounds = array<i64: 1, 128>}, {pipeline_mode = #tpu.pipeline_mode<synchronous>, transform_indices = @transform_11, window_bounds = array<i64: 384, 64>}, {pipeline_mode = #tpu.pipeline_mode<synchronous>, transform_indices = @transform_12, window_bounds = array<i64: 1, 64>}, {pipeline_mode = #tpu.pipeline_mode<synchronous>, transform_indices = @transform_13, window_bounds = array<i64: 192, 256>}, {pipeline_mode = #tpu.pipeline_mode<synchronous>, transform_indices = @transform_14, window_bounds = array<i64: 1, 256>}, {pipeline_mode = #tpu.pipeline_mode<synchronous>, transform_indices = @transform_15, window_bounds = array<i64: 384, 128>}, {pipeline_mode = #tpu.pipeline_mode<synchronous>, transform_indices = @transform_16, window_bounds = array<i64: 1, 128>}, {transform_indices = @transform_17, window_bounds = array<i64: 1, 16, 128>}]} {
    %c0 = arith.constant 0 : index
    %c0_0 = arith.constant 0 : index
    %c0_1 = arith.constant 0 : index
    %0 = vector.load %arg1[%c0, %c0_0, %c0_1] : memref<1x16x32xf32, #tpu.memory_space<vmem>>, vector<1x16x32xf32>
    %1 = arith.truncf %0 : vector<1x16x32xf32> to vector<1x16x32xbf16>
    %2 = vector.extract_strided_slice %1 {offsets = [0, 15, 0], sizes = [1, 1, 32], strides = [1, 1, 1]} : vector<1x16x32xbf16> to vector<1x1x32xbf16>
    %3 = vector.extract_strided_slice %1 {offsets = [0, 0, 0], sizes = [1, 15, 32], strides = [1, 1, 1]} : vector<1x16x32xbf16> to vector<1x15x32xbf16>
    %4 = tpu.concatenate %2, %3 in 1 : vector<1x1x32xbf16>, vector<1x15x32xbf16> -> vector<1x16x32xbf16>
    %5 = vector.extract_strided_slice %1 {offsets = [0, 1, 0], sizes = [1, 15, 32], strides = [1, 1, 1]} : vector<1x16x32xbf16> to vector<1x15x32xbf16>
    %6 = vector.extract_strided_slice %1 {offsets = [0, 0, 0], sizes = [1, 1, 32], strides = [1, 1, 1]} : vector<1x16x32xbf16> to vector<1x1x32xbf16>
    %7 = tpu.concatenate %5, %6 in 1 : vector<1x15x32xbf16>, vector<1x1x32xbf16> -> vector<1x16x32xbf16>
    %8 = tpu.concatenate %4, %1, %7 in 2 : vector<1x16x32xbf16>, vector<1x16x32xbf16>, vector<1x16x32xbf16> -> vector<1x16x96xbf16>
    %9 = vector.shape_cast %8 : vector<1x16x96xbf16> to vector<16x96xbf16>
    %c0_2 = arith.constant 0 : index
    %c0_3 = arith.constant 0 : index
    %10 = vector.load %arg2[%c0_2, %c0_3] : memref<96x192xbf16, #tpu.memory_space<vmem>>, vector<96x192xbf16>
    %cst = arith.constant dense<0.000000e+00> : vector<16x192xf32>
    %11 = tpu.matmul %9, %10, %cst {dimension_numbers = #tpu.dot_dimension_numbers<[1], [0], [0], [1], [0, 0, 1, 1], [], []>} : vector<16x96xbf16>, vector<96x192xbf16>, vector<16x192xf32> -> vector<16x192xf32>
    %c0_4 = arith.constant 0 : index
    %c0_5 = arith.constant 0 : index
    %12 = vector.load %arg3[%c0_4, %c0_5] : memref<1x192xf32, #tpu.memory_space<vmem>>, vector<1x192xf32>
    %13 = vector.broadcast %12 : vector<1x192xf32> to vector<16x192xf32>
    %14 = arith.addf %11, %13 : vector<16x192xf32>
    %15 = vector.shape_cast %14 : vector<16x192xf32> to vector<1x16x192xf32>
    %16 = vector.extract_strided_slice %15 {offsets = [0, 0, 0], sizes = [1, 16, 128], strides = [1, 1, 1]} : vector<1x16x192xf32> to vector<1x16x128xf32>
    %cst_6 = arith.constant 0.000000e+00 : f32
    %17 = vector.broadcast %cst_6 : f32 to vector<1x16x128xf32>
    %18 = arith.maximumf %16, %17 : vector<1x16x128xf32>
    %19 = vector.extract_strided_slice %15 {offsets = [0, 0, 128], sizes = [1, 16, 64], strides = [1, 1, 1]} : vector<1x16x192xf32> to vector<1x16x64xf32>
    %20 = arith.truncf %18 : vector<1x16x128xf32> to vector<1x16x128xbf16>
    %21 = vector.extract_strided_slice %20 {offsets = [0, 15, 0], sizes = [1, 1, 128], strides = [1, 1, 1]} : vector<1x16x128xbf16> to vector<1x1x128xbf16>
    %22 = vector.extract_strided_slice %20 {offsets = [0, 0, 0], sizes = [1, 15, 128], strides = [1, 1, 1]} : vector<1x16x128xbf16> to vector<1x15x128xbf16>
    %23 = tpu.concatenate %21, %22 in 1 : vector<1x1x128xbf16>, vector<1x15x128xbf16> -> vector<1x16x128xbf16>
    %24 = vector.extract_strided_slice %20 {offsets = [0, 1, 0], sizes = [1, 15, 128], strides = [1, 1, 1]} : vector<1x16x128xbf16> to vector<1x15x128xbf16>
    %25 = vector.extract_strided_slice %20 {offsets = [0, 0, 0], sizes = [1, 1, 128], strides = [1, 1, 1]} : vector<1x16x128xbf16> to vector<1x1x128xbf16>
    %26 = tpu.concatenate %24, %25 in 1 : vector<1x15x128xbf16>, vector<1x1x128xbf16> -> vector<1x16x128xbf16>
    %27 = tpu.concatenate %23, %20, %26 in 2 : vector<1x16x128xbf16>, vector<1x16x128xbf16>, vector<1x16x128xbf16> -> vector<1x16x384xbf16>
    %28 = vector.shape_cast %27 : vector<1x16x384xbf16> to vector<16x384xbf16>
    %c0_7 = arith.constant 0 : index
    %c0_8 = arith.constant 0 : index
    %29 = vector.load %arg4[%c0_7, %c0_8] : memref<384x64xbf16, #tpu.memory_space<vmem>>, vector<384x64xbf16>
    %cst_9 = arith.constant dense<0.000000e+00> : vector<16x64xf32>
    %30 = tpu.matmul %28, %29, %cst_9 {dimension_numbers = #tpu.dot_dimension_numbers<[1], [0], [0], [1], [0, 0, 1, 1], [], []>} : vector<16x384xbf16>, vector<384x64xbf16>, vector<16x64xf32> -> vector<16x64xf32>
    %c0_10 = arith.constant 0 : index
    %c0_11 = arith.constant 0 : index
    %31 = vector.load %arg5[%c0_10, %c0_11] : memref<1x64xf32, #tpu.memory_space<vmem>>, vector<1x64xf32>
    %32 = vector.broadcast %31 : vector<1x64xf32> to vector<16x64xf32>
    %33 = arith.addf %30, %32 : vector<16x64xf32>
    %34 = vector.shape_cast %33 : vector<16x64xf32> to vector<1x16x64xf32>
    %35 = arith.addf %34, %19 : vector<1x16x64xf32>
    %cst_12 = arith.constant 0.000000e+00 : f32
    %36 = vector.broadcast %cst_12 : f32 to vector<1x16x64xf32>
    %37 = arith.maximumf %35, %36 : vector<1x16x64xf32>
    %38 = arith.truncf %37 : vector<1x16x64xf32> to vector<1x16x64xbf16>
    %39 = vector.extract_strided_slice %38 {offsets = [0, 14, 0], sizes = [1, 2, 64], strides = [1, 1, 1]} : vector<1x16x64xbf16> to vector<1x2x64xbf16>
    %40 = vector.extract_strided_slice %38 {offsets = [0, 0, 0], sizes = [1, 14, 64], strides = [1, 1, 1]} : vector<1x16x64xbf16> to vector<1x14x64xbf16>
    %41 = tpu.concatenate %39, %40 in 1 : vector<1x2x64xbf16>, vector<1x14x64xbf16> -> vector<1x16x64xbf16>
    %42 = vector.extract_strided_slice %38 {offsets = [0, 2, 0], sizes = [1, 14, 64], strides = [1, 1, 1]} : vector<1x16x64xbf16> to vector<1x14x64xbf16>
    %43 = vector.extract_strided_slice %38 {offsets = [0, 0, 0], sizes = [1, 2, 64], strides = [1, 1, 1]} : vector<1x16x64xbf16> to vector<1x2x64xbf16>
    %44 = tpu.concatenate %42, %43 in 1 : vector<1x14x64xbf16>, vector<1x2x64xbf16> -> vector<1x16x64xbf16>
    %45 = tpu.concatenate %41, %38, %44 in 2 : vector<1x16x64xbf16>, vector<1x16x64xbf16>, vector<1x16x64xbf16> -> vector<1x16x192xbf16>
    %46 = vector.shape_cast %45 : vector<1x16x192xbf16> to vector<16x192xbf16>
    %c0_13 = arith.constant 0 : index
    %c0_14 = arith.constant 0 : index
    %47 = vector.load %arg6[%c0_13, %c0_14] : memref<192x128xbf16, #tpu.memory_space<vmem>>, vector<192x128xbf16>
    %cst_15 = arith.constant dense<0.000000e+00> : vector<16x128xf32>
    %48 = tpu.matmul %46, %47, %cst_15 {dimension_numbers = #tpu.dot_dimension_numbers<[1], [0], [0], [1], [0, 0, 1, 1], [], []>} : vector<16x192xbf16>, vector<192x128xbf16>, vector<16x128xf32> -> vector<16x128xf32>
    %c0_16 = arith.constant 0 : index
    %c0_17 = arith.constant 0 : index
    %49 = vector.load %arg7[%c0_16, %c0_17] : memref<1x128xf32, #tpu.memory_space<vmem>>, vector<1x128xf32>
    %50 = vector.broadcast %49 : vector<1x128xf32> to vector<16x128xf32>
    %51 = arith.addf %48, %50 : vector<16x128xf32>
    %52 = vector.shape_cast %51 : vector<16x128xf32> to vector<1x16x128xf32>
    %cst_18 = arith.constant 0.000000e+00 : f32
    %53 = vector.broadcast %cst_18 : f32 to vector<1x16x128xf32>
    %54 = arith.maximumf %52, %53 : vector<1x16x128xf32>
    %55 = arith.truncf %54 : vector<1x16x128xf32> to vector<1x16x128xbf16>
    %56 = vector.extract_strided_slice %55 {offsets = [0, 14, 0], sizes = [1, 2, 128], strides = [1, 1, 1]} : vector<1x16x128xbf16> to vector<1x2x128xbf16>
    %57 = vector.extract_strided_slice %55 {offsets = [0, 0, 0], sizes = [1, 14, 128], strides = [1, 1, 1]} : vector<1x16x128xbf16> to vector<1x14x128xbf16>
    %58 = tpu.concatenate %56, %57 in 1 : vector<1x2x128xbf16>, vector<1x14x128xbf16> -> vector<1x16x128xbf16>
    %59 = vector.extract_strided_slice %55 {offsets = [0, 2, 0], sizes = [1, 14, 128], strides = [1, 1, 1]} : vector<1x16x128xbf16> to vector<1x14x128xbf16>
    %60 = vector.extract_strided_slice %55 {offsets = [0, 0, 0], sizes = [1, 2, 128], strides = [1, 1, 1]} : vector<1x16x128xbf16> to vector<1x2x128xbf16>
    %61 = tpu.concatenate %59, %60 in 1 : vector<1x14x128xbf16>, vector<1x2x128xbf16> -> vector<1x16x128xbf16>
    %62 = tpu.concatenate %58, %55, %61 in 2 : vector<1x16x128xbf16>, vector<1x16x128xbf16>, vector<1x16x128xbf16> -> vector<1x16x384xbf16>
    %63 = vector.shape_cast %62 : vector<1x16x384xbf16> to vector<16x384xbf16>
    %c0_19 = arith.constant 0 : index
    %c0_20 = arith.constant 0 : index
    %64 = vector.load %arg8[%c0_19, %c0_20] : memref<384x64xbf16, #tpu.memory_space<vmem>>, vector<384x64xbf16>
    %cst_21 = arith.constant dense<0.000000e+00> : vector<16x64xf32>
    %65 = tpu.matmul %63, %64, %cst_21 {dimension_numbers = #tpu.dot_dimension_numbers<[1], [0], [0], [1], [0, 0, 1, 1], [], []>} : vector<16x384xbf16>, vector<384x64xbf16>, vector<16x64xf32> -> vector<16x64xf32>
    %c0_22 = arith.constant 0 : index
    %c0_23 = arith.constant 0 : index
    %66 = vector.load %arg9[%c0_22, %c0_23] : memref<1x64xf32, #tpu.memory_space<vmem>>, vector<1x64xf32>
    %67 = vector.broadcast %66 : vector<1x64xf32> to vector<16x64xf32>
    %68 = arith.addf %65, %67 : vector<16x64xf32>
    %69 = vector.shape_cast %68 : vector<16x64xf32> to vector<1x16x64xf32>
    %70 = arith.addf %69, %37 : vector<1x16x64xf32>
    %cst_24 = arith.constant 0.000000e+00 : f32
    %71 = vector.broadcast %cst_24 : f32 to vector<1x16x64xf32>
    %72 = arith.maximumf %70, %71 : vector<1x16x64xf32>
    %73 = arith.truncf %72 : vector<1x16x64xf32> to vector<1x16x64xbf16>
    %74 = vector.extract_strided_slice %73 {offsets = [0, 15, 0], sizes = [1, 1, 64], strides = [1, 1, 1]} : vector<1x16x64xbf16> to vector<1x1x64xbf16>
    %75 = vector.extract_strided_slice %73 {offsets = [0, 0, 0], sizes = [1, 15, 64], strides = [1, 1, 1]} : vector<1x16x64xbf16> to vector<1x15x64xbf16>
    %76 = tpu.concatenate %74, %75 in 1 : vector<1x1x64xbf16>, vector<1x15x64xbf16> -> vector<1x16x64xbf16>
    %77 = vector.extract_strided_slice %73 {offsets = [0, 1, 0], sizes = [1, 15, 64], strides = [1, 1, 1]} : vector<1x16x64xbf16> to vector<1x15x64xbf16>
    %78 = vector.extract_strided_slice %73 {offsets = [0, 0, 0], sizes = [1, 1, 64], strides = [1, 1, 1]} : vector<1x16x64xbf16> to vector<1x1x64xbf16>
    %79 = tpu.concatenate %77, %78 in 1 : vector<1x15x64xbf16>, vector<1x1x64xbf16> -> vector<1x16x64xbf16>
    %80 = tpu.concatenate %76, %73, %79 in 2 : vector<1x16x64xbf16>, vector<1x16x64xbf16>, vector<1x16x64xbf16> -> vector<1x16x192xbf16>
    %81 = vector.shape_cast %80 : vector<1x16x192xbf16> to vector<16x192xbf16>
    %c0_25 = arith.constant 0 : index
    %c0_26 = arith.constant 0 : index
    %82 = vector.load %arg10[%c0_25, %c0_26] : memref<192x128xbf16, #tpu.memory_space<vmem>>, vector<192x128xbf16>
    %cst_27 = arith.constant dense<0.000000e+00> : vector<16x128xf32>
    %83 = tpu.matmul %81, %82, %cst_27 {dimension_numbers = #tpu.dot_dimension_numbers<[1], [0], [0], [1], [0, 0, 1, 1], [], []>} : vector<16x192xbf16>, vector<192x128xbf16>, vector<16x128xf32> -> vector<16x128xf32>
    %c0_28 = arith.constant 0 : index
    %c0_29 = arith.constant 0 : index
    %84 = vector.load %arg11[%c0_28, %c0_29] : memref<1x128xf32, #tpu.memory_space<vmem>>, vector<1x128xf32>
    %85 = vector.broadcast %84 : vector<1x128xf32> to vector<16x128xf32>
    %86 = arith.addf %83, %85 : vector<16x128xf32>
    %87 = vector.shape_cast %86 : vector<16x128xf32> to vector<1x16x128xf32>
    %cst_30 = arith.constant 0.000000e+00 : f32
    %88 = vector.broadcast %cst_30 : f32 to vector<1x16x128xf32>
    %89 = arith.maximumf %87, %88 : vector<1x16x128xf32>
    %90 = arith.truncf %89 : vector<1x16x128xf32> to vector<1x16x128xbf16>
    %91 = vector.extract_strided_slice %90 {offsets = [0, 15, 0], sizes = [1, 1, 128], strides = [1, 1, 1]} : vector<1x16x128xbf16> to vector<1x1x128xbf16>
    %92 = vector.extract_strided_slice %90 {offsets = [0, 0, 0], sizes = [1, 15, 128], strides = [1, 1, 1]} : vector<1x16x128xbf16> to vector<1x15x128xbf16>
    %93 = tpu.concatenate %91, %92 in 1 : vector<1x1x128xbf16>, vector<1x15x128xbf16> -> vector<1x16x128xbf16>
    %94 = vector.extract_strided_slice %90 {offsets = [0, 1, 0], sizes = [1, 15, 128], strides = [1, 1, 1]} : vector<1x16x128xbf16> to vector<1x15x128xbf16>
    %95 = vector.extract_strided_slice %90 {offsets = [0, 0, 0], sizes = [1, 1, 128], strides = [1, 1, 1]} : vector<1x16x128xbf16> to vector<1x1x128xbf16>
    %96 = tpu.concatenate %94, %95 in 1 : vector<1x15x128xbf16>, vector<1x1x128xbf16> -> vector<1x16x128xbf16>
    %97 = tpu.concatenate %93, %90, %96 in 2 : vector<1x16x128xbf16>, vector<1x16x128xbf16>, vector<1x16x128xbf16> -> vector<1x16x384xbf16>
    %98 = vector.shape_cast %97 : vector<1x16x384xbf16> to vector<16x384xbf16>
    %c0_31 = arith.constant 0 : index
    %c0_32 = arith.constant 0 : index
    %99 = vector.load %arg12[%c0_31, %c0_32] : memref<384x64xbf16, #tpu.memory_space<vmem>>, vector<384x64xbf16>
    %cst_33 = arith.constant dense<0.000000e+00> : vector<16x64xf32>
    %100 = tpu.matmul %98, %99, %cst_33 {dimension_numbers = #tpu.dot_dimension_numbers<[1], [0], [0], [1], [0, 0, 1, 1], [], []>} : vector<16x384xbf16>, vector<384x64xbf16>, vector<16x64xf32> -> vector<16x64xf32>
    %c0_34 = arith.constant 0 : index
    %c0_35 = arith.constant 0 : index
    %101 = vector.load %arg13[%c0_34, %c0_35] : memref<1x64xf32, #tpu.memory_space<vmem>>, vector<1x64xf32>
    %102 = vector.broadcast %101 : vector<1x64xf32> to vector<16x64xf32>
    %103 = arith.addf %100, %102 : vector<16x64xf32>
    %104 = vector.shape_cast %103 : vector<16x64xf32> to vector<1x16x64xf32>
    %105 = arith.addf %104, %72 : vector<1x16x64xf32>
    %cst_36 = arith.constant 0.000000e+00 : f32
    %106 = vector.broadcast %cst_36 : f32 to vector<1x16x64xf32>
    %107 = arith.maximumf %105, %106 : vector<1x16x64xf32>
    %108 = arith.truncf %107 : vector<1x16x64xf32> to vector<1x16x64xbf16>
    %109 = vector.extract_strided_slice %108 {offsets = [0, 14, 0], sizes = [1, 2, 64], strides = [1, 1, 1]} : vector<1x16x64xbf16> to vector<1x2x64xbf16>
    %110 = vector.extract_strided_slice %108 {offsets = [0, 0, 0], sizes = [1, 14, 64], strides = [1, 1, 1]} : vector<1x16x64xbf16> to vector<1x14x64xbf16>
    %111 = tpu.concatenate %109, %110 in 1 : vector<1x2x64xbf16>, vector<1x14x64xbf16> -> vector<1x16x64xbf16>
    %112 = vector.extract_strided_slice %108 {offsets = [0, 2, 0], sizes = [1, 14, 64], strides = [1, 1, 1]} : vector<1x16x64xbf16> to vector<1x14x64xbf16>
    %113 = vector.extract_strided_slice %108 {offsets = [0, 0, 0], sizes = [1, 2, 64], strides = [1, 1, 1]} : vector<1x16x64xbf16> to vector<1x2x64xbf16>
    %114 = tpu.concatenate %112, %113 in 1 : vector<1x14x64xbf16>, vector<1x2x64xbf16> -> vector<1x16x64xbf16>
    %115 = tpu.concatenate %111, %108, %114 in 2 : vector<1x16x64xbf16>, vector<1x16x64xbf16>, vector<1x16x64xbf16> -> vector<1x16x192xbf16>
    %116 = vector.shape_cast %115 : vector<1x16x192xbf16> to vector<16x192xbf16>
    %c0_37 = arith.constant 0 : index
    %c0_38 = arith.constant 0 : index
    %117 = vector.load %arg14[%c0_37, %c0_38] : memref<192x256xbf16, #tpu.memory_space<vmem>>, vector<192x256xbf16>
    %cst_39 = arith.constant dense<0.000000e+00> : vector<16x256xf32>
    %118 = tpu.matmul %116, %117, %cst_39 {dimension_numbers = #tpu.dot_dimension_numbers<[1], [0], [0], [1], [0, 0, 1, 1], [], []>} : vector<16x192xbf16>, vector<192x256xbf16>, vector<16x256xf32> -> vector<16x256xf32>
    %c0_40 = arith.constant 0 : index
    %c0_41 = arith.constant 0 : index
    %119 = vector.load %arg15[%c0_40, %c0_41] : memref<1x256xf32, #tpu.memory_space<vmem>>, vector<1x256xf32>
    %120 = vector.broadcast %119 : vector<1x256xf32> to vector<16x256xf32>
    %121 = arith.addf %118, %120 : vector<16x256xf32>
    %122 = vector.shape_cast %121 : vector<16x256xf32> to vector<1x16x256xf32>
    %123 = vector.extract_strided_slice %122 {offsets = [0, 0, 0], sizes = [1, 16, 128], strides = [1, 1, 1]} : vector<1x16x256xf32> to vector<1x16x128xf32>
    %cst_42 = arith.constant 0.000000e+00 : f32
    %124 = vector.broadcast %cst_42 : f32 to vector<1x16x128xf32>
    %125 = arith.maximumf %123, %124 : vector<1x16x128xf32>
    %126 = vector.extract_strided_slice %122 {offsets = [0, 0, 128], sizes = [1, 16, 128], strides = [1, 1, 1]} : vector<1x16x256xf32> to vector<1x16x128xf32>
    %127 = arith.truncf %125 : vector<1x16x128xf32> to vector<1x16x128xbf16>
    %128 = vector.extract_strided_slice %127 {offsets = [0, 14, 0], sizes = [1, 2, 128], strides = [1, 1, 1]} : vector<1x16x128xbf16> to vector<1x2x128xbf16>
    %129 = vector.extract_strided_slice %127 {offsets = [0, 0, 0], sizes = [1, 14, 128], strides = [1, 1, 1]} : vector<1x16x128xbf16> to vector<1x14x128xbf16>
    %130 = tpu.concatenate %128, %129 in 1 : vector<1x2x128xbf16>, vector<1x14x128xbf16> -> vector<1x16x128xbf16>
    %131 = vector.extract_strided_slice %127 {offsets = [0, 2, 0], sizes = [1, 14, 128], strides = [1, 1, 1]} : vector<1x16x128xbf16> to vector<1x14x128xbf16>
    %132 = vector.extract_strided_slice %127 {offsets = [0, 0, 0], sizes = [1, 2, 128], strides = [1, 1, 1]} : vector<1x16x128xbf16> to vector<1x2x128xbf16>
    %133 = tpu.concatenate %131, %132 in 1 : vector<1x14x128xbf16>, vector<1x2x128xbf16> -> vector<1x16x128xbf16>
    %134 = tpu.concatenate %130, %127, %133 in 2 : vector<1x16x128xbf16>, vector<1x16x128xbf16>, vector<1x16x128xbf16> -> vector<1x16x384xbf16>
    %135 = vector.shape_cast %134 : vector<1x16x384xbf16> to vector<16x384xbf16>
    %c0_43 = arith.constant 0 : index
    %c0_44 = arith.constant 0 : index
    %136 = vector.load %arg16[%c0_43, %c0_44] : memref<384x128xbf16, #tpu.memory_space<vmem>>, vector<384x128xbf16>
    %cst_45 = arith.constant dense<0.000000e+00> : vector<16x128xf32>
    %137 = tpu.matmul %135, %136, %cst_45 {dimension_numbers = #tpu.dot_dimension_numbers<[1], [0], [0], [1], [0, 0, 1, 1], [], []>} : vector<16x384xbf16>, vector<384x128xbf16>, vector<16x128xf32> -> vector<16x128xf32>
    %c0_46 = arith.constant 0 : index
    %c0_47 = arith.constant 0 : index
    %138 = vector.load %arg17[%c0_46, %c0_47] : memref<1x128xf32, #tpu.memory_space<vmem>>, vector<1x128xf32>
    %139 = vector.broadcast %138 : vector<1x128xf32> to vector<16x128xf32>
    %140 = arith.addf %137, %139 : vector<16x128xf32>
    %141 = vector.shape_cast %140 : vector<16x128xf32> to vector<1x16x128xf32>
    %142 = arith.addf %141, %126 : vector<1x16x128xf32>
    %cst_48 = arith.constant 0.000000e+00 : f32
    %143 = vector.broadcast %cst_48 : f32 to vector<1x16x128xf32>
    %144 = arith.maximumf %142, %143 : vector<1x16x128xf32>
    %c0_49 = arith.constant 0 : index
    %c0_50 = arith.constant 0 : index
    %c0_51 = arith.constant 0 : index
    %145 = vector.load %arg18[%c0_49, %c0_50, %c0_51] : memref<1x16x128xf32, #tpu.memory_space<vmem>>, vector<1x16x128xf32>
    tpu.vector_store %arg18[%c0_49, %c0_50, %c0_51], %144 {strides = array<i32>} : memref<1x16x128xf32, #tpu.memory_space<vmem>>, vector<1x16x128xf32>,
    return
  }
  func.func @transform_0(%arg0: i32) -> (i32, i32, i32) {
    %c0_i32 = arith.constant 0 : i32
    %c0_i32_0 = arith.constant 0 : i32
    %c0_i32_1 = arith.constant 0 : i32
    return %arg0, %c0_i32, %c0_i32_0 : i32, i32, i32
  }
  func.func @transform_1(%arg0: i32) -> (i32, i32) {
    %c0_i32 = arith.constant 0 : i32
    %c0_i32_0 = arith.constant 0 : i32
    %c0_i32_1 = arith.constant 0 : i32
    return %c0_i32, %c0_i32_0 : i32, i32
  }
  func.func @transform_2(%arg0: i32) -> (i32, i32) {
    %c0_i32 = arith.constant 0 : i32
    %c0_i32_0 = arith.constant 0 : i32
    %c0_i32_1 = arith.constant 0 : i32
    return %c0_i32, %c0_i32_0 : i32, i32
  }
  func.func @transform_3(%arg0: i32) -> (i32, i32) {
    %c0_i32 = arith.constant 0 : i32
    %c0_i32_0 = arith.constant 0 : i32
    %c0_i32_1 = arith.constant 0 : i32
    return %c0_i32, %c0_i32_0 : i32, i32
  }
  func.func @transform_4(%arg0: i32) -> (i32, i32) {
    %c0_i32 = arith.constant 0 : i32
    %c0_i32_0 = arith.constant 0 : i32
    %c0_i32_1 = arith.constant 0 : i32
    return %c0_i32, %c0_i32_0 : i32, i32
  }
  func.func @transform_5(%arg0: i32) -> (i32, i32) {
    %c0_i32 = arith.constant 0 : i32
    %c0_i32_0 = arith.constant 0 : i32
    %c0_i32_1 = arith.constant 0 : i32
    return %c0_i32, %c0_i32_0 : i32, i32
  }
  func.func @transform_6(%arg0: i32) -> (i32, i32) {
    %c0_i32 = arith.constant 0 : i32
    %c0_i32_0 = arith.constant 0 : i32
    %c0_i32_1 = arith.constant 0 : i32
    return %c0_i32, %c0_i32_0 : i32, i32
  }
  func.func @transform_7(%arg0: i32) -> (i32, i32) {
    %c0_i32 = arith.constant 0 : i32
    %c0_i32_0 = arith.constant 0 : i32
    %c0_i32_1 = arith.constant 0 : i32
    return %c0_i32, %c0_i32_0 : i32, i32
  }
  func.func @transform_8(%arg0: i32) -> (i32, i32) {
    %c0_i32 = arith.constant 0 : i32
    %c0_i32_0 = arith.constant 0 : i32
    %c0_i32_1 = arith.constant 0 : i32
    return %c0_i32, %c0_i32_0 : i32, i32
  }
  func.func @transform_9(%arg0: i32) -> (i32, i32) {
    %c0_i32 = arith.constant 0 : i32
    %c0_i32_0 = arith.constant 0 : i32
    %c0_i32_1 = arith.constant 0 : i32
    return %c0_i32, %c0_i32_0 : i32, i32
  }
  func.func @transform_10(%arg0: i32) -> (i32, i32) {
    %c0_i32 = arith.constant 0 : i32
    %c0_i32_0 = arith.constant 0 : i32
    %c0_i32_1 = arith.constant 0 : i32
    return %c0_i32, %c0_i32_0 : i32, i32
  }
  func.func @transform_11(%arg0: i32) -> (i32, i32) {
    %c0_i32 = arith.constant 0 : i32
    %c0_i32_0 = arith.constant 0 : i32
    %c0_i32_1 = arith.constant 0 : i32
    return %c0_i32, %c0_i32_0 : i32, i32
  }
  func.func @transform_12(%arg0: i32) -> (i32, i32) {
    %c0_i32 = arith.constant 0 : i32
    %c0_i32_0 = arith.constant 0 : i32
    %c0_i32_1 = arith.constant 0 : i32
    return %c0_i32, %c0_i32_0 : i32, i32
  }
  func.func @transform_13(%arg0: i32) -> (i32, i32) {
    %c0_i32 = arith.constant 0 : i32
    %c0_i32_0 = arith.constant 0 : i32
    %c0_i32_1 = arith.constant 0 : i32
    return %c0_i32, %c0_i32_0 : i32, i32
  }
  func.func @transform_14(%arg0: i32) -> (i32, i32) {
    %c0_i32 = arith.constant 0 : i32
    %c0_i32_0 = arith.constant 0 : i32
    %c0_i32_1 = arith.constant 0 : i32
    return %c0_i32, %c0_i32_0 : i32, i32
  }
  func.func @transform_15(%arg0: i32) -> (i32, i32) {
    %c0_i32 = arith.constant 0 : i32
    %c0_i32_0 = arith.constant 0 : i32
    %c0_i32_1 = arith.constant 0 : i32
    return %c0_i32, %c0_i32_0 : i32, i32
  }
  func.func @transform_16(%arg0: i32) -> (i32, i32) {
    %c0_i32 = arith.constant 0 : i32
    %c0_i32_0 = arith.constant 0 : i32
    %c0_i32_1 = arith.constant 0 : i32
    return %c0_i32, %c0_i32_0 : i32, i32
  }
  func.func @transform_17(%arg0: i32) -> (i32, i32, i32) {
    %c0_i32 = arith.constant 0 : i32
    %c0_i32_0 = arith.constant 0 : i32
    %c0_i32_1 = arith.constant 0 : i32
    return %arg0, %c0_i32, %c0_i32_0 : i32, i32, i32
  }
}

</mosaic_0001>

<bundles_post_ra>
// kernel: _model_forward.1
= control target key start
LH: loop header
LB: loop body
LE: loop exit
PB: predicated region body
PF: predicated region fallthrough
CT: control target
= control target key end

     0   :  { %s4043_s0 = inlined_call_operand.vmem [shape: f32[2,16,32], index: 0, kind: input, shape index: {}]   ;;  %s4044_s1 = inlined_call_operand.vmem [shape: bf16[96,192], index: 1, kind: input, shape index: {}]   ;;  %s4045_s2 = inlined_call_operand.vmem [shape: f32[1,192], index: 2, kind: input, shape index: {}]   ;;  %s4046_s3 = inlined_call_operand.vmem [shape: bf16[384,64], index: 3, kind: input, shape index: {}]   ;;  %s4047_s4 = inlined_call_operand.vmem [shape: f32[1,64], index: 4, kind: input, shape index: {}]   ;;  %s4048_s5 = inlined_call_operand.vmem [shape: bf16[192,128], index: 5, kind: input, shape index: {}]   ;;  %s4049_s6 = inlined_call_operand.vmem [shape: f32[1,128], index: 6, kind: input, shape index: {}]   ;;  %s4050_s7 = inlined_call_operand.vmem [shape: bf16[384,64], index: 7, kind: input, shape index: {}]   ;;  %s4051_s8 = inlined_call_operand.vmem [shape: f32[1,64], index: 8, kind: input, shape index: {}]   ;;  %s4052_s9 = inlined_call_operand.vmem [shape: bf16[192,128], index: 9, kind: input, shape index: {}]   ;;  %s4053_s10 = inlined_call_operand.vmem [shape: f32[1,128], index: 10, kind: input, shape index: {}]   ;;  %s4054_s11 = inlined_call_operand.vmem [shape: bf16[384,64], index: 11, kind: input, shape index: {}]   ;;  %s4055_s12 = inlined_call_operand.vmem [shape: f32[1,64], index: 12, kind: input, shape index: {}]   ;;  %s4056_s13 = inlined_call_operand.vmem [shape: bf16[192,256], index: 13, kind: input, shape index: {}]   ;;  %s4057_s14 = inlined_call_operand.vmem [shape: f32[1,256], index: 14, kind: input, shape index: {}]   ;;  %s4058_s15 = inlined_call_operand.vmem [shape: bf16[384,128], index: 15, kind: input, shape index: {}]   ;;  %s4059_s16 = inlined_call_operand.vmem [shape: f32[1,128], index: 16, kind: input, shape index: {}]   ;;  %s4060_s17 = inlined_call_operand.hbm [shape: f32[2,16,128], index: 17, kind: output, shape index: {}]  }
   0x1   :  { %4069 = sst [smem:[#allocation11_spill]] %s4043_s0 }
   0x2   :  { %4070 = sst [smem:[#allocation12_spill]] %s4044_s1 }
   0x3   :  { %4071 = sst [smem:[#allocation13_spill]] %s4045_s2 }
   0x4   :  { %4072 = sst [smem:[#allocation14_spill]] %s4060_s17 }
   0x5   :  { %22 = vsyncpa [#allocation3], 0 }
   0x6   :  { %24 = vsyncpa [#allocation3 + $0x1], 0  ;;  %s3302_s24 = smov 0   ;;  %s3304_s25 = smov 0  }
   0x7   :  { %s3306_s26 = smov 0   ;;  %s3308_s27 = smov 0  }
   0x8 LB: > { %4073 = sst [smem:[#allocation5_spill]] %s3190_s24  ;;  %s3323_s28 = sadd.s32 4294967295, %s3202_s27   ;;  %s3202_s27 = sphi %s3308_s27, %s4093_s27   ;;  %s3198_s26 = sphi %s3306_s26, %s4095_s26   ;;  %s3194_s25 = sphi %s3304_s25, %s4097_s25   ;;  %s3190_s24 = sphi %s3302_s24, %s4096_s24  }
   0x9   : > { %4074 = sst [smem:[#allocation6_spill]] %s3198_s26  ;;  %s2538_s29 = sadd.s32 4294967294, %s3202_s27  }
   0xa   : > { %4075 = sst [smem:[#allocation7_spill]] %s3202_s27  ;;  %s3327_s0 = sadd.s32 1, %s3202_s27  }
   0xb   : > { %4076 = sst [smem:[#allocation8_spill]] %s3327_s0  ;;  %s399_s30 = sadd.s32 1, %s3198_s26 }
   0xc   : > { %s396_s18 = ssub.s32 %s3202_s27, %s3327_s0  ;;  %p409_p0 = scmp.ne.s32.totalorder %s3198_s26, %s3194_s25 }
   0xd   : > { %p397_p1 = scmp.eq.s32.totalorder %s396_s18, 0  ;;  %p410_p2 = scmp.eq.s32.totalorder %s3323_s28, 1 }
   0xe   : > { %p415_p3 = scmp.ne.s32.totalorder %s3194_s25, %s3190_s24  ;;  %p416_p4 = scmp.eq.s32.totalorder %s2538_s29, 1 }
   0xf   : > { %s3338_s19 = scalar_select %p397_p1, %s3198_s26, %s399_s30  }
  0x10   : > { %p3340_p5 = por %p410_p2, %p409_p0  ;;  %p3344_p6 = por %p416_p4, %p415_p3 }
  0x11   : > { %4077 = sst [smem:[#allocation9_spill]] %s3338_s19  ;;  %p2541_p7 = scmp.ge.s32.totalorder %s3202_s27, 1 }
  0x12   : > { %s4079_s20 = scalar_select %p3344_p6, 1, 0 }
  0x13   : > { %p490_p8 = scmp.lt.s32.totalorder %s3202_s27, 3 }
  0x14   : > { %4080 = sst [smem:[#allocation10_spill]] %s4079_s20 }
  0x15   : > { %p491_p9 = pnand %p2541_p7, %p490_p8 }
  0x16   : > { %p542_p10 = scmp.lt.s32.totalorder (!%p491_p9), %s3323_s28, 1  ;;  %s4081_s23 = sld [smem:[#allocation12_spill]] (!%p491_p9) }
  0x17   : > { %494 = sbr.rel (%p491_p9) target bundleno = 2192 (0x890), region = 88  ;;  %s4082_s27 = sld [smem:[#allocation11_spill]] (!%p491_p9) }
  0x18   : > { %s4087_s2 = sld [smem:[#allocation13_spill]] (!%p491_p9)  ;;  %s539_s21 = sand.u32 (!%p491_p9), 1, %s3194_s25  }
  0x19   : > { %s2542_s22 = sshll.u32 (!%p491_p9), %s539_s21, 4  ;;  %s4003_s19 = scalar_lea.sflag (!%p491_p9), [#allocation3], %s539_s21 }
  0x1a   : > { %s541_s18 = scalar_lea.vmem (!%p491_p9), [#allocation2], %s2542_s22 }
  0x1b   : > { %s2476_s24 = sshll.u32 (!%p491_p9), %s541_s18, 4  ;;  %s4001_s24 = int_to_ptr.vmem [resolvable:$true] %s2476_s24 }
  0x1c   : > { %v2968_v0 = vld [vmem:[%s4081_s23 + $0x54] ss:$8 sps:$4 sm:$0xff]   ;;  %s543_s29 = scalar_select %p542_p10, %s3323_s28, 1  ;;  %v2970_v1 = vld [vmem:[%s4081_s23 + $0x50] ss:$8 sps:$4 sm:$0xff]   ;;  %vm568_vm0 = vcmask 1047552   ;;  %v599_v55 = vlaneseq }
  0x1d   : > { %676 = vmatprep.subr.bf16.mxu0 %v2968_v0  ;;  %v2971_v2 = vld [vmem:[%s4081_s23 + $0x44] ss:$8 sps:$4 sm:$0xff]   ;;  %v2973_v3 = vld [vmem:[%s4081_s23 + $0x40] ss:$8 sps:$4 sm:$0xff]   ;;  %v3204_v4 = vmov 0   ;;  %vm560_vm3 = vcmask 1040384  }
  0x1e   : > { %s2716_s0 = sshll.u32 %s543_s29, 4  ;;  %677 = vmatpush1.bf16.msra.mxu0 %v2970_v1  ;;  %704 = vmatprep.mubr.bf16.mxu0 %v3204_v4  ;;  %vm569_vm1 = vsmask.f32 7424  ;;  %v2974_v5 = vld [vmem:[%s4081_s23 + $0x34] ss:$8 sps:$4 sm:$0xff]   ;;  %s3206_s29 = smov 64  }
  0x1f   : > { %s546_s30 = scalar_lea.vmem %s4082_s27, %s2716_s0  ;;  %678 = vmatprep.subr.bf16.mxu0 %v2971_v2  ;;  %vm3371_vm2 = vmand %vm568_vm0, %vm569_vm1  ;;  %v2976_v10 = vld [vmem:[%s4081_s23 + $0x30] ss:$8 sps:$4 sm:$0xff]   ;;  %vm561_vm4 = vsmask.f32 256  ;;  %s3205_s27 = smov 32   ;;  %v2992_v29 = vld [vmem:[%s4046_s3 + $0x68] sm:$0xff]  }
  0x20   : > { %v548_v6 = vld [vmem:[%s546_s30] sm:$0xff]  ;;  %v549_v7 = vld [vmem:[%s546_s30 + $0x8] sm:$0xff]  ;;  %v2986_v14 = vld [vmem:[%s4046_s3 + $0x78] sm:$0xff]   ;;  %v3207_v34 = vmov 0.0   ;;  %vm578_vm6 = vcmask 261120   ;;  %vm582_vm7 = vcmask 523264  }
  0x21   : > { %v550_v8 = vpack.c.bf16 %v549_v7, %v548_v6  ;;  %v2977_v13 = vld [vmem:[%s4081_s23 + $0x24] ss:$8 sps:$4 sm:$0xff]   ;;  %v2979_v15 = vld [vmem:[%s4081_s23 + $0x20] ss:$8 sps:$4 sm:$0xff]   ;;  %vm3387_vm5 = vmand %vm560_vm3, %vm561_vm4  ;;  %2718 = vmatprep.subr.bf16.mxu1 %v2986_v14  ;;  %vm669_vm8 = vcmask 785408   ;;  %vm3208_vm9 = vmmov 0  }
  0x22   : > { %679 = vmatpush1.bf16.msra.mxu0 %v2973_v3  ;;  %v2987_v19 = vld [vmem:[%s4046_s3 + $0x38] sm:$0xff]   ;;  %v2989_v24 = vld [vmem:[%s4046_s3 + $0x70] sm:$0xff]   ;;  %v2983_v28 = vld [vmem:[%s4081_s23 + $0x4] ss:$8 sps:$4 sm:$0xff]   ;;  %v3489_v56 = vshrl.u32 %v599_v55, 7  ;;  %s2717_s30 = sshll.u32 %s3323_s28, 8 }
  0x23   : > { %573 = vrot.lane.b32.xlu0 %v550_v8, %s3205_s27  ;;  %v552_v11 = vshrl.u32 %v550_v8, 16  ;;  %v556_v12 = vshll.u32 %v550_v8, 16  ;;  %680 = vmatprep.subr.bf16.mxu0 %v2974_v5  ;;  %v2980_v21 = vld [vmem:[%s4081_s23 + $0x14] ss:$8 sps:$4 sm:$0xff]   ;;  %v2982_v23 = vld [vmem:[%s4081_s23 + $0x10] ss:$8 sps:$4 sm:$0xff]  }
  0x24   : > { %2719 = vmatpush3.bf16.msra.mxu1 %v2987_v19  ;;  %v2990_v27 = vld [vmem:[%s4046_s3 + $0x30] sm:$0xff]   ;;  %v2993_v30 = vld [vmem:[%s4046_s3 + $0x28] sm:$0xff]   ;;  %v2995_v32 = vld [vmem:[%s4046_s3 + $0x60] sm:$0xff]   ;;  %v601_v57 = vsub.s32 0, %v3489_v56  ;;  %s4088_s27 = sld [smem:[#allocation14_spill]]  ;;  %s3142_s20 = scalar_lea.vmem %s4001_s24, 256 }
  0x25   : > { %v564_v16 = vrot.slane %v556_v12, 1  ;;  %v554_v18 = vrot.slane %v552_v11, 7  ;;  %2720 = vmatprep.subr.bf16.mxu1 %v2989_v24  ;;  %v2985_v31 = vld [vmem:[%s4081_s23] ss:$8 sps:$4 sm:$0xff]   ;;  %v2988_v36 = vld [vmem:[%s4046_s3 + $0xb8] sm:$0xff]   ;;  %v2991_v40 = vld [vmem:[%s4046_s3 + $0xb0] sm:$0xff]   ;;  %p3143_p11 = scmp.ne.s32.totalorder %s4001_s24, %s3142_s20 }
  0x26   : > { %681 = vmatpush1.bf16.msra.mxu0 %v2976_v10  ;;  %v2996_v33 = vld [vmem:[%s4046_s3 + $0x20] sm:$0xff]   ;;  %v2994_v41 = vld [vmem:[%s4046_s3 + $0xa8] sm:$0xff]   ;;  %v2998_v43 = vld [vmem:[%s4046_s3 + $0x58] sm:$0xff]   ;;  %s3209_s28 = smov [#allocation2]  }
  0x27   : > { %v565_v20 = vor.u32 %v564_v16, %v552_v11  ;;  %682 = vmatprep.subr.bf16.mxu0 %v2977_v13  ;;  %v558_v22 = vor.u32 %v556_v12, %v554_v18  ;;  %v2997_v42 = vld [vmem:[%s4046_s3 + $0xa0] sm:$0xff]   ;;  %v2999_v44 = vld [vmem:[%s4046_s3 + $0x18] sm:$0xff]   ;;  %v3001_v46 = vld [vmem:[%s4046_s3 + $0x50] sm:$0xff]   ;;  %p3144_p12 = pnand %p3143_p11, %p3340_p5  ;;  %s3146_s22 = sshll.u32 %s3209_s28, 4  ;;  %s3147_s22 = int_to_ptr.vmem [resolvable:$false] %s3146_s22 }
  0x28   : > { %2721 = vmatpush3.bf16.msra.mxu1 %v2990_v27  ;;  %v3000_v45 = vld [vmem:[%s4046_s3 + $0x98] sm:$0xff]   ;;  %v3002_v47 = vld [vmem:[%s4046_s3 + $0x10] sm:$0xff]   ;;  %v3004_v49 = vld [vmem:[%s4046_s3 + $0x48] sm:$0xff]   ;;  %s3148_s26 = scalar_lea.vmem %s3147_s22, 512  ;;  %p3149_p0 = scmp.lt.s32.totalorder %s4001_s24, %s3147_s22 }
  0x29   : > { %v571_v25 = vsel %vm3371_vm2, %v565_v20, %v564_v16  ;;  %v563_v26 = vsel %vm3387_vm5, %v554_v18, %v558_v22  ;;  %2722 = vmatprep.subr.bf16.mxu1 %v2992_v29  ;;  %v3003_v48 = vld [vmem:[%s4046_s3 + $0x90] sm:$0xff]   ;;  %v3005_v50 = vld [vmem:[%s4046_s3 + $0x8] sm:$0xff]   ;;  %v3007_v52 = vld [vmem:[%s4046_s3 + $0x40] sm:$0xff]   ;;  %p3145_p13 = pneg %p3144_p12  ;;  %p3150_p1 = scmp.lt.s32.totalorder %s3148_s26, %s3142_s20 }
  0x2a   : > { %576 = vrot.lane.b32.xlu0 %v571_v25, %s3206_s29  ;;  %683 = vmatpush1.bf16.msra.mxu0 %v2979_v15  ;;  %v3006_v51 = vld [vmem:[%s4046_s3 + $0x88] sm:$0xff]   ;;  %v3008_v53 = vld [vmem:[%s4046_s3] sm:$0xff]   ;;  %v3010_v14 = vld [vmem:[%s4048_s5 + $0x38] sm:$0xff]   ;;  %s4089_s17 = smov %s4088_s27  ;;  %s3999_s0 = scalar_lea.hbm %s4088_s27, %s2717_s30 }
  0x2b   : > { %684 = vmatprep.subr.bf16.mxu0 %v2980_v21  ;;  %v3009_v54 = vld [vmem:[%s4046_s3 + $0x80] sm:$0xff]   ;;  %v3011_v15 = vld [vmem:[%s4048_s5 + $0x30] sm:$0xff]   ;;  %v3012_v16 = vld [vmem:[%s4048_s5 + $0x28] sm:$0xff]   ;;  %p3151_p2 = por %p3150_p1, %p3149_p0 }
  0x2c   : > { %2723 = vmatpush3.bf16.msra.mxu1 %v2993_v30  ;;  %v3495_v58 = vld [vmem:[%s4087_s2] sm:$0x3]  ;;  %v3014_v19 = vld [vmem:[%s4048_s5 + $0x18] sm:$0xff]   ;;  %v3015_v20 = vld [vmem:[%s4048_s5 + $0x10] sm:$0xff]   ;;  %v605_v30 = vsub.s32 1, %v3489_v56 }
  0x2d   : > { %2724 = vmatprep.subr.bf16.mxu1 %v2995_v32  ;;  %v602_v59 = vrot.slane %v3495_v58, %v601_v57  ;;  %v3013_v18 = vld [vmem:[%s4048_s5 + $0x20] sm:$0xff]   ;;  %v3016_v21 = vld [vmem:[%s4048_s5 + $0x8] sm:$0xff]   ;;  %v3019_v24 = vld [vmem:[%s4048_s5 + $0x50] sm:$0xff]   ;;  %p3152_p3 = pnand %p3151_p2, %p3145_p13 }
  0x2e   : > { %685 = vmatpush1.bf16.msra.mxu0 %v2982_v23  ;;  %v3017_v22 = vld [vmem:[%s4048_s5] sm:$0xff]   ;;  %v3018_v23 = vld [vmem:[%s4048_s5 + $0x58] sm:$0xff]   ;;  %v3020_v25 = vld [vmem:[%s4048_s5 + $0x48] sm:$0xff]  }
  0x2f   : > { %686 = vmatprep.subr.bf16.mxu0 %v2983_v28  ;;  %v3029_v55 = vld [vmem:[%s4050_s7 + $0x28] sm:$0xff]   ;;  %v3090_v17 = vld [vmem:[%s4056_s13 + $0x54] ss:$8 sps:$4 sm:$0xff]  }
  0x30   : > { %2725 = vmatpush3.bf16.msra.mxu1 %v2996_v33  ;;  %v3085_v9 = vld [vmem:[%s4056_s13 + $0x60] ss:$8 sps:$4 sm:$0xff]  }
  0x31   : > { %2726 = vmatprep.subr.bf16.mxu1 %v2998_v43 }
  0x32   : > { %687 = vmatpush1.bf16.msra.mxu0 %v2985_v31  ;;  %v2558_v31 = vld [vmem:[%s4047_s4] ss:$0 sm:$0xff] }
  0x33   : > { %2842 = vmatprep.subr.bf16.mxu0 %v3207_v34 }
  0x34   : > { %2727 = vmatpush3.bf16.msra.mxu1 %v2999_v44  ;;  %v3022_v44 = vld [vmem:[%s4050_s7 + $0x78] sm:$0xff]  }
  0x35   : > { %2728 = vmatprep.subr.bf16.mxu1 %v3001_v46  ;;  %v3025_v46 = vld [vmem:[%s4050_s7 + $0x70] sm:$0xff]  }
  0x38   : > { %2729 = vmatpush3.bf16.msra.mxu1 %v3002_v47 }
  0x39   : > { %2730 = vmatprep.subr.bf16.mxu1 %v3004_v49  ;;  %v3026_v49 = vld [vmem:[%s4050_s7 + $0x30] sm:$0xff]  }
  0x3c   : > { %2731 = vmatpush3.bf16.msra.mxu1 %v3005_v50 }
  0x3d   : > { %2732 = vmatprep.subr.bf16.mxu1 %v3007_v52 }
  0x40   : > { %2733 = vmatpush3.bf16.msra.mxu1 %v3008_v53  ;;  %v3028_v53 = vld [vmem:[%s4050_s7 + $0x68] sm:$0xff]  }
  0x41   : > { %1138 = vmatprep.subr.bf16.mxu1 %v3204_v4 }
  0x95   : > { %v574_v35 = vpop.permute.xlu0 %573 }
  0x96   : > { %v581_v37 = vsel %vm578_vm6, %v563_v26, %v574_v35  ;;  %v3021_v26 = vld [vmem:[%s4048_s5 + $0x40] sm:$0xff]  }
  0x9c   : > { %v577_v38 = vpop.permute.xlu0 %576 }
  0x9d   : > { %v584_v39 = vsel %vm582_vm7, %v581_v37, %v577_v38  ;;  %v606_v38 = vrot.slane %v3495_v58, %v605_v30 }
  0x9e   : > { %2557 = vmatmul.mubr.msk.bf16.vlgmr.msra.gmra.mxu0 %vm669_vm8, %v584_v39 }
  0x9f   : > { %2843 = vmatpush3.bf16.msra.mxu0 %v2988_v36  ;;  %2858 = vmatprep.mubr.msk.bf16.mxu0 %vm3208_vm9, %v3207_v34 }
  0xa0   : > { %2844 = vmatprep.subr.bf16.mxu0 %v3207_v34 }
  0xa3   : > { %2845 = vmatpush3.bf16.msra.mxu0 %v2991_v40 }
  0xa4   : > { %2846 = vmatprep.subr.bf16.mxu0 %v3207_v34 }
  0xa7   : > { %2847 = vmatpush3.bf16.msra.mxu0 %v2994_v41 }
  0xa8   : > { %2848 = vmatprep.subr.bf16.mxu0 %v3207_v34 }
  0xab   : > { %2849 = vmatpush3.bf16.msra.mxu0 %v2997_v42 }
  0xac   : > { %2850 = vmatprep.subr.bf16.mxu0 %v3207_v34 }
  0xaf   : > { %2851 = vmatpush3.bf16.msra.mxu0 %v3000_v45  ;;  %v3023_v45 = vld [vmem:[%s4050_s7 + $0x38] sm:$0xff]  }
  0xb0   : > { %2852 = vmatprep.subr.bf16.mxu0 %v3207_v34 }
  0xb3   : > { %2853 = vmatpush3.bf16.msra.mxu0 %v3003_v48 }
  0xb4   : > { %2854 = vmatprep.subr.bf16.mxu0 %v3207_v34 }
  0xb7   : > { %2855 = vmatpush3.bf16.msra.mxu0 %v3006_v51 }
  0xb8   : > { %2856 = vmatprep.subr.bf16.mxu0 %v3207_v34 }
  0xbb   : > { %2857 = vmatpush3.bf16.msra.mxu0 %v3009_v54 }
  0xbc   : > { %2749 = vmatprep.subr.bf16.mxu0 %v3022_v44  ;;  %v3054_v44 = vld [vmem:[%s4052_s9 + $0x58] sm:$0xff]  }
 0x15e   : > { %v706_v60 = vpop.f32.mrf.mxu0 }
 0x15f   : > { %v707_v62 = vadd.f32 %v706_v60, %v602_v59  ;;  %v3031_v60 = vld [vmem:[%s4050_s7 + $0x60] sm:$0xff]  }
 0x160   : > { %v3500_v61 = vpop.f32.mrf.mxu0 }
 0x161   : > { %v715_v1 = vmax.f32 %v707_v62, 0.0  ;;  %v709_v47 = vadd.f32 %v3500_v61, %v606_v38  ;;  %v3032_v62 = vld [vmem:[%s4050_s7 + $0x20] sm:$0xff]  }
 0x162   : > { %v710_v63 = vpop.f32.mrf.mxu0 }
 0x163   : > { %v711_v0 = vadd.f32 %v710_v63, %v602_v59 }
 0x164   : > { %v712_v27 = vpop.f32.mrf.mxu0 }
 0x165   : > { %v716_v2 = vmax.f32 %v711_v0, 0.0  ;;  %v713_v50 = vadd.f32 %v712_v27, %v606_v38  ;;  %v3034_v0 = vld [vmem:[%s4050_s7 + $0x58] sm:$0xff]   ;;  %v3048_v38 = vld [vmem:[%s4052_s9 + $0x28] sm:$0xff]  }
 0x167   : > { %v717_v3 = vpack.c.bf16 %v716_v2, %v715_v1  ;;  %v3035_v1 = vld [vmem:[%s4050_s7 + $0x18] sm:$0xff]  }
 0x169   : > { %v719_v5 = vshrl.u32 %v717_v3, 16  ;;  %v723_v6 = vshll.u32 %v717_v3, 16  ;;  %964 = vmatprep.mubr.bf16.mxu1 %v717_v3  ;;  %v3024_v3 = vld [vmem:[%s4050_s7 + $0xb8] sm:$0xff]  }
 0x16b   : > { %v721_v7 = vrot.slane %v719_v5, 7  ;;  %v728_v8 = vrot.slane %v723_v6, 1 }
 0x16d   : > { %v725_v10 = vor.u32 %v723_v6, %v721_v7  ;;  %v729_v11 = vor.u32 %v728_v8, %v719_v5 }
 0x16f   : > { %v727_v12 = vsel %vm3387_vm5, %v721_v7, %v725_v10  ;;  %v732_v13 = vsel %vm3371_vm2, %v729_v11, %v728_v8  ;;  %v3027_v7 = vld [vmem:[%s4050_s7 + $0xb0] sm:$0xff]   ;;  %v3030_v8 = vld [vmem:[%s4050_s7 + $0xa8] sm:$0xff]   ;;  %v3033_v10 = vld [vmem:[%s4050_s7 + $0xa0] sm:$0xff]  }
 0x170   : > { %965 = vmatmul.mubr.bf16.vlgmr.msra.gmra.mxu1 %v727_v12  ;;  %2859 = vmatmul.mubr.bf16.vlgmr.msra.gmra.mxu0 %v732_v13  ;;  %v3036_v11 = vld [vmem:[%s4050_s7 + $0x98] sm:$0xff]   ;;  %v3037_v12 = vld [vmem:[%s4050_s7 + $0x50] sm:$0xff]  }
 0x171   : > { %1139 = vmatpush1.bf16.msra.mxu1 %v3010_v14  ;;  %2750 = vmatpush3.bf16.msra.mxu0 %v3023_v45  ;;  %v3038_v13 = vld [vmem:[%s4050_s7 + $0x10] sm:$0xff]  }
 0x172   : > { %1140 = vmatprep.subr.bf16.mxu1 %v3204_v4  ;;  %2751 = vmatprep.subr.bf16.mxu0 %v3025_v46  ;;  %v3039_v14 = vld [vmem:[%s4050_s7 + $0x90] sm:$0xff]   ;;  %v3056_v46 = vld [vmem:[%s4052_s9 + $0x48] sm:$0xff]  }
 0x173   : > { %v3055_v45 = vld [vmem:[%s4052_s9 + $0x50] sm:$0xff]  }
 0x175   : > { %1141 = vmatpush1.bf16.msra.mxu1 %v3011_v15  ;;  %2752 = vmatpush3.bf16.msra.mxu0 %v3026_v49  ;;  %v3040_v15 = vld [vmem:[%s4050_s7 + $0x48] sm:$0xff]  }
 0x176   : > { %1142 = vmatprep.subr.bf16.mxu1 %v3204_v4  ;;  %2753 = vmatprep.subr.bf16.mxu0 %v3028_v53 }
 0x179   : > { %1143 = vmatpush1.bf16.msra.mxu1 %v3012_v16  ;;  %2754 = vmatpush3.bf16.msra.mxu0 %v3029_v55  ;;  %v3041_v16 = vld [vmem:[%s4050_s7 + $0x8] sm:$0xff]  }
 0x17a   : > { %1144 = vmatprep.subr.bf16.mxu1 %v3204_v4  ;;  %2755 = vmatprep.subr.bf16.mxu0 %v3031_v60 }
 0x17d   : > { %1145 = vmatpush1.bf16.msra.mxu1 %v3013_v18  ;;  %2756 = vmatpush3.bf16.msra.mxu0 %v3032_v62  ;;  %v3042_v18 = vld [vmem:[%s4050_s7 + $0x88] sm:$0xff]  }
 0x17e   : > { %1146 = vmatprep.subr.bf16.mxu1 %v3204_v4  ;;  %2757 = vmatprep.subr.bf16.mxu0 %v3034_v0 }
 0x181   : > { %1147 = vmatpush1.bf16.msra.mxu1 %v3014_v19  ;;  %2758 = vmatpush3.bf16.msra.mxu0 %v3035_v1  ;;  %v3043_v19 = vld [vmem:[%s4050_s7 + $0x40] sm:$0xff]  }
 0x182   : > { %1148 = vmatprep.subr.bf16.mxu1 %v3204_v4  ;;  %2759 = vmatprep.subr.bf16.mxu0 %v3037_v12 }
 0x185   : > { %1149 = vmatpush1.bf16.msra.mxu1 %v3015_v20  ;;  %2760 = vmatpush3.bf16.msra.mxu0 %v3038_v13  ;;  %v3044_v20 = vld [vmem:[%s4050_s7] sm:$0xff]   ;;  %v3065_v13 = vld [vmem:[%s4054_s11 + $0x28] sm:$0xff]  }
 0x186   : > { %1150 = vmatprep.subr.bf16.mxu1 %v3204_v4  ;;  %2761 = vmatprep.subr.bf16.mxu0 %v3040_v15 }
 0x189   : > { %1151 = vmatpush1.bf16.msra.mxu1 %v3016_v21  ;;  %2762 = vmatpush3.bf16.msra.mxu0 %v3041_v16  ;;  %v3045_v21 = vld [vmem:[%s4050_s7 + $0x80] sm:$0xff]  }
 0x18a   : > { %1152 = vmatprep.subr.bf16.mxu1 %v3204_v4  ;;  %2763 = vmatprep.subr.bf16.mxu0 %v3043_v19 }
 0x18d   : > { %1153 = vmatpush1.bf16.msra.mxu1 %v3017_v22  ;;  %2764 = vmatpush3.bf16.msra.mxu0 %v3044_v20  ;;  %v2583_v22 = vld [vmem:[%s4049_s6] ss:$0 sm:$0xff] }
 0x18e   : > { %1162 = vmatprep.subr.bf16.mxu1 %v3204_v4  ;;  %1605 = vmatprep.subr.bf16.mxu0 %v3204_v4 }
 0x191   : > { %1163 = vmatpush2.bf16.msra.mxu1 %v3018_v23 }
 0x192   : > { %1164 = vmatprep.subr.bf16.mxu1 %v3204_v4 }
 0x195   : > { %1165 = vmatpush2.bf16.msra.mxu1 %v3019_v24 }
 0x196   : > { %1166 = vmatprep.subr.bf16.mxu1 %v3204_v4 }
 0x199   : > { %1167 = vmatpush2.bf16.msra.mxu1 %v3020_v25 }
 0x19a   : > { %1168 = vmatprep.subr.bf16.mxu1 %v3204_v4 }
 0x19d   : > { %1169 = vmatpush2.bf16.msra.mxu1 %v3021_v26 }
 0x19e   : > { %2862 = vmatprep.subr.bf16.mxu1 %v3207_v34 }
 0x230   : > { %v2734_v28 = vpop.f32.mrf.mxu1  ;;  %v1007_v29 = vpop.f32.mrf.mxu0 }
 0x232   : > { %v2735_v32 = vpop.f32.mrf.mxu1  ;;  %v2860_v33 = vpop.f32.mrf.mxu0 }
 0x233   : > { %v2736_v35 = vadd.f32 %v2735_v32, %v2734_v28 }
 0x234   : > { %v2737_v36 = vpop.f32.mrf.mxu1  ;;  %v1010_v37 = vpop.f32.mrf.mxu0 }
 0x235   : > { %v967_v39 = vadd.f32 %v2736_v35, %v2558_v31 }
 0x236   : > { %v2738_v40 = vpop.f32.mrf.mxu1  ;;  %v2861_v41 = vpop.f32.mrf.mxu0 }
 0x237   : > { %v1008_v42 = vadd.f32 %v1007_v29, %v967_v39  ;;  %v2739_v43 = vadd.f32 %v2738_v40, %v2737_v36  ;;  %v3046_v36 = vld [vmem:[%s4052_s9 + $0x38] sm:$0xff]   ;;  %v3049_v39 = vld [vmem:[%s4052_s9 + $0x20] sm:$0xff]   ;;  %v3051_v41 = vld [vmem:[%s4052_s9 + $0x10] sm:$0xff]  }
 0x238   : > { %v3050_v40 = vld [vmem:[%s4052_s9 + $0x18] sm:$0xff]  }
 0x239   : > { %v970_v48 = vadd.f32 %v2739_v43, %v2558_v31  ;;  %v3574_v52 = vadd.f32 %v1008_v42, %v709_v47  ;;  %v3052_v42 = vld [vmem:[%s4052_s9 + $0x8] sm:$0xff]   ;;  %v3053_v43 = vld [vmem:[%s4052_s9] sm:$0xff]  }
 0x23a   : > { %v3057_v47 = vld [vmem:[%s4052_s9 + $0x40] sm:$0xff]  }
 0x23b   : > { %v1011_v51 = vadd.f32 %v1010_v37, %v970_v48  ;;  %v1016_v58 = vmax.f32 %v3574_v52, 0.0  ;;  %v3047_v37 = vld [vmem:[%s4052_s9 + $0x30] sm:$0xff]  }
 0x23d   : > { %v3579_v54 = vadd.f32 %v1011_v51, %v713_v50  ;;  %v2597_v50 = vld [vmem:[%s4051_s8] ss:$0 sm:$0xff] }
 0x23f   : > { %v1017_v59 = vmax.f32 %v3579_v54, 0.0 }
 0x241   : > { %v1018_v61 = vpack.c.bf16 %v1017_v59, %v1016_v58 }
 0x243   : > { %1028 = vrot.lane.b32.xlu1 %v1018_v61, %s3206_s29  ;;  %v1024_v63 = vrot.slane %v1018_v61, 1  ;;  %v1020_v2 = vrot.slane %v1018_v61, 7 }
 0x245   : > { %2596 = vmatprep.mubr.msk.bf16.mxu1 %vm582_vm7, %v1024_v63 }
 0x2b5   : > { %v1029_v5 = vpop.permute.xlu1 %1028 }
 0x2b6   : > { %v1031_v6 = vsel %vm582_vm7, %v1020_v2, %v1029_v5  ;;  %v3061_v5 = vld [vmem:[%s4054_s11 + $0x70] sm:$0xff]  }
 0x2b7   : > { %1171 = vmatmul.mubr.bf16.vlgmr.msra.gmra.mxu1 %v1031_v6 }
 0x2b8   : > { %2863 = vmatpush3.bf16.msra.mxu1 %v3024_v3  ;;  %2878 = vmatprep.mubr.msk.bf16.mxu1 %vm3208_vm9, %v3207_v34  ;;  %v3059_v3 = vld [vmem:[%s4054_s11 + $0x38] sm:$0xff]  }
 0x2b9   : > { %2864 = vmatprep.subr.bf16.mxu1 %v3207_v34 }
 0x2bc   : > { %2865 = vmatpush3.bf16.msra.mxu1 %v3027_v7  ;;  %v3062_v7 = vld [vmem:[%s4054_s11 + $0x30] sm:$0xff]  }
 0x2bd   : > { %2866 = vmatprep.subr.bf16.mxu1 %v3207_v34 }
 0x2c0   : > { %2867 = vmatpush3.bf16.msra.mxu1 %v3030_v8 }
 0x2c1   : > { %2868 = vmatprep.subr.bf16.mxu1 %v3207_v34 }
 0x2c4   : > { %2869 = vmatpush3.bf16.msra.mxu1 %v3033_v10 }
 0x2c5   : > { %2870 = vmatprep.subr.bf16.mxu1 %v3207_v34 }
 0x2c8   : > { %2871 = vmatpush3.bf16.msra.mxu1 %v3036_v11  ;;  %v3064_v11 = vld [vmem:[%s4054_s11 + $0x68] sm:$0xff]  }
 0x2c9   : > { %2872 = vmatprep.subr.bf16.mxu1 %v3207_v34 }
 0x2cc   : > { %2873 = vmatpush3.bf16.msra.mxu1 %v3039_v14 }
 0x2cd   : > { %2874 = vmatprep.subr.bf16.mxu1 %v3207_v34 }
 0x2d0   : > { %2875 = vmatpush3.bf16.msra.mxu1 %v3042_v18 }
 0x2d1   : > { %2876 = vmatprep.subr.bf16.mxu1 %v3207_v34 }
 0x2d4   : > { %2877 = vmatpush3.bf16.msra.mxu1 %v3045_v21 }
 0x377   : > { %v1172_v23 = vpop.f32.mrf.mxu1 }
 0x378   : > { %v1173_v25 = vadd.f32 %v2583_v22, %v1172_v23 }
 0x379   : > { %v1174_v24 = vpop.f32.mrf.mxu1 }
 0x37a   : > { %v1179_v29 = vmax.f32 %v1173_v25, 0.0  ;;  %v3060_v24 = vld [vmem:[%s4054_s11 + $0xb8] sm:$0xff]  }
 0x37b   : > { %v1175_v26 = vpop.f32.mrf.mxu1 }
 0x37c   : > { %v1176_v27 = vadd.f32 %v2583_v22, %v1175_v26 }
 0x37d   : > { %v1177_v28 = vpop.f32.mrf.mxu1 }
 0x37e   : > { %v1180_v31 = vmax.f32 %v1176_v27, 0.0  ;;  %v3063_v27 = vld [vmem:[%s4054_s11 + $0xb0] sm:$0xff]   ;;  %v3066_v28 = vld [vmem:[%s4054_s11 + $0xa8] sm:$0xff]  }
 0x380   : > { %v1181_v32 = vpack.c.bf16 %v1180_v31, %v1179_v29  ;;  %v3069_v29 = vld [vmem:[%s4054_s11 + $0xa0] sm:$0xff]   ;;  %v3070_v31 = vld [vmem:[%s4054_s11 + $0x58] sm:$0xff]  }
 0x382   : > { %1422 = vmatprep.mubr.bf16.mxu0 %v1181_v32  ;;  %v1183_v33 = vrot.slane %v1181_v32, 7  ;;  %v1187_v35 = vrot.slane %v1181_v32, 1  ;;  %v3071_v32 = vld [vmem:[%s4054_s11 + $0x18] sm:$0xff]  }
 0x384   : > { %1423 = vmatmul.mubr.bf16.vlgmr.msra.gmra.mxu0 %v1183_v33  ;;  %2879 = vmatmul.mubr.bf16.vlgmr.msra.gmra.mxu1 %v1187_v35  ;;  %v3072_v33 = vld [vmem:[%s4054_s11 + $0x98] sm:$0xff]   ;;  %v3073_v35 = vld [vmem:[%s4054_s11 + $0x50] sm:$0xff]  }
 0x385   : > { %1606 = vmatpush1.bf16.msra.mxu0 %v3046_v36  ;;  %v3074_v36 = vld [vmem:[%s4054_s11 + $0x10] sm:$0xff]  }
 0x386   : > { %1607 = vmatprep.subr.bf16.mxu0 %v3204_v4 }
 0x389   : > { %1608 = vmatpush1.bf16.msra.mxu0 %v3047_v37  ;;  %v3075_v37 = vld [vmem:[%s4054_s11 + $0x90] sm:$0xff]  }
 0x38a   : > { %1609 = vmatprep.subr.bf16.mxu0 %v3204_v4 }
 0x38d   : > { %1610 = vmatpush1.bf16.msra.mxu0 %v3048_v38  ;;  %v3076_v38 = vld [vmem:[%s4054_s11 + $0x48] sm:$0xff]  }
 0x38e   : > { %1611 = vmatprep.subr.bf16.mxu0 %v3204_v4 }
 0x391   : > { %1612 = vmatpush1.bf16.msra.mxu0 %v3049_v39  ;;  %v3077_v39 = vld [vmem:[%s4054_s11 + $0x8] sm:$0xff]  }
 0x392   : > { %1613 = vmatprep.subr.bf16.mxu0 %v3204_v4 }
 0x395   : > { %1614 = vmatpush1.bf16.msra.mxu0 %v3050_v40  ;;  %v3078_v40 = vld [vmem:[%s4054_s11 + $0x88] sm:$0xff]  }
 0x396   : > { %1615 = vmatprep.subr.bf16.mxu0 %v3204_v4 }
 0x399   : > { %1616 = vmatpush1.bf16.msra.mxu0 %v3051_v41  ;;  %v3079_v41 = vld [vmem:[%s4054_s11 + $0x40] sm:$0xff]  }
 0x39a   : > { %1617 = vmatprep.subr.bf16.mxu0 %v3204_v4 }
 0x39d   : > { %1618 = vmatpush1.bf16.msra.mxu0 %v3052_v42  ;;  %v3080_v42 = vld [vmem:[%s4054_s11] sm:$0xff]  }
 0x39e   : > { %1619 = vmatprep.subr.bf16.mxu0 %v3204_v4 }
 0x3a1   : > { %1620 = vmatpush1.bf16.msra.mxu0 %v3053_v43  ;;  %v3081_v43 = vld [vmem:[%s4054_s11 + $0x80] sm:$0xff]  }
 0x3a2   : > { %1629 = vmatprep.subr.bf16.mxu0 %v3204_v4 }
 0x3a5   : > { %1630 = vmatpush2.bf16.msra.mxu0 %v3054_v44  ;;  %v2622_v44 = vld [vmem:[%s4053_s10] ss:$0 sm:$0xff] }
 0x3a6   : > { %1631 = vmatprep.subr.bf16.mxu0 %v3204_v4 }
 0x3a9   : > { %1632 = vmatpush2.bf16.msra.mxu0 %v3055_v45 }
 0x3aa   : > { %1633 = vmatprep.subr.bf16.mxu0 %v3204_v4 }
 0x3ad   : > { %1634 = vmatpush2.bf16.msra.mxu0 %v3056_v46 }
 0x3ae   : > { %1635 = vmatprep.subr.bf16.mxu0 %v3204_v4  ;;  %v3058_v4 = vld [vmem:[%s4054_s11 + $0x78] sm:$0xff]  }
 0x3af   : > { %2780 = vmatprep.subr.bf16.mxu1 %v3058_v4 }
 0x3b0   : > { %2781 = vmatpush3.bf16.msra.mxu1 %v3059_v3  ;;  %v3082_v3 = vld [vmem:[%s4056_s13 + $0x70] ss:$8 sps:$4 sm:$0xff]  }
 0x3b1   : > { %1636 = vmatpush2.bf16.msra.mxu0 %v3057_v47  ;;  %2782 = vmatprep.subr.bf16.mxu1 %v3061_v5  ;;  %v3084_v5 = vld [vmem:[%s4056_s13 + $0x74] ss:$8 sps:$4 sm:$0xff]  }
 0x3b2   : > { %2882 = vmatprep.subr.bf16.mxu0 %v3207_v34 }
 0x3b4   : > { %2783 = vmatpush3.bf16.msra.mxu1 %v3062_v7  ;;  %v3088_v7 = vld [vmem:[%s4056_s13 + $0x50] ss:$8 sps:$4 sm:$0xff]  }
 0x3b5   : > { %2784 = vmatprep.subr.bf16.mxu1 %v3064_v11  ;;  %v3091_v11 = vld [vmem:[%s4056_s13 + $0x40] ss:$8 sps:$4 sm:$0xff]  }
 0x3b8   : > { %2785 = vmatpush3.bf16.msra.mxu1 %v3065_v13  ;;  %v3096_v13 = vld [vmem:[%s4056_s13 + $0x34] ss:$8 sps:$4 sm:$0xff]  }
 0x444   : > { %v2765_v48 = vpop.f32.mrf.mxu0  ;;  %v1465_v49 = vpop.f32.mrf.mxu1 }
 0x446   : > { %v2766_v51 = vpop.f32.mrf.mxu0  ;;  %v2880_v53 = vpop.f32.mrf.mxu1 }
 0x447   : > { %v2767_v55 = vadd.f32 %v2766_v51, %v2765_v48 }
 0x448   : > { %v2768_v60 = vpop.f32.mrf.mxu0  ;;  %v1468_v61 = vpop.f32.mrf.mxu1 }
 0x449   : > { %v1425_v62 = vadd.f32 %v2767_v55, %v2597_v50 }
 0x44a   : > { %v2769_v63 = vpop.f32.mrf.mxu0  ;;  %v2881_v0 = vpop.f32.mrf.mxu1 }
 0x44b   : > { %v1466_v1 = vadd.f32 %v1465_v49, %v1425_v62  ;;  %v2770_v2 = vadd.f32 %v2769_v63, %v2768_v60 }
 0x44d   : > { %v1428_v6 = vadd.f32 %v2770_v2, %v2597_v50  ;;  %v3725_v10 = vadd.f32 %v1466_v1, %v1016_v58  ;;  %v3067_v58 = vld [vmem:[%s4054_s11 + $0x60] sm:$0xff]  }
 0x44e   : > { %2786 = vmatprep.subr.bf16.mxu1 %v3067_v58  ;;  %v3094_v58 = vld [vmem:[%s4056_s13 + $0x30] ss:$8 sps:$4 sm:$0xff]  }
 0x44f   : > { %v1469_v8 = vadd.f32 %v1468_v61, %v1428_v6  ;;  %v1474_v14 = vmax.f32 %v3725_v10, 0.0  ;;  %v3087_v6 = vld [vmem:[%s4056_s13 + $0x64] ss:$8 sps:$4 sm:$0xff]  }
 0x450   : > { %v3127_v10 = vld [vmem:[%s4058_s15 + $0x60] sm:$0xff]  }
 0x451   : > { %v3732_v12 = vadd.f32 %v1469_v8, %v1017_v59  ;;  %v3068_v59 = vld [vmem:[%s4054_s11 + $0x20] sm:$0xff]  }
 0x452   : > { %2787 = vmatpush3.bf16.msra.mxu1 %v3068_v59  ;;  %v3093_v8 = vld [vmem:[%s4056_s13 + $0x44] ss:$8 sps:$4 sm:$0xff]   ;;  %v3097_v59 = vld [vmem:[%s4056_s13 + $0x20] ss:$8 sps:$4 sm:$0xff]  }
 0x453   : > { %v1475_v52 = vmax.f32 %v3732_v12, 0.0  ;;  %2788 = vmatprep.subr.bf16.mxu1 %v3070_v31  ;;  %v2636_v31 = vld [vmem:[%s4055_s12] ss:$0 sm:$0xff] }
 0x455   : > { %v1476_v54 = vpack.c.bf16 %v1475_v52, %v1474_v14 }
 0x456   : > { %2789 = vmatpush3.bf16.msra.mxu1 %v3071_v32 }
 0x457   : > { %1493 = vrot.lane.b32.xlu1 %v1476_v54, %s3206_s29  ;;  %v1478_v15 = vshrl.u32 %v1476_v54, 16  ;;  %v1482_v16 = vshll.u32 %v1476_v54, 16  ;;  %2790 = vmatprep.subr.bf16.mxu1 %v3073_v35  ;;  %v3099_v54 = vld [vmem:[%s4056_s13 + $0x24] ss:$8 sps:$4 sm:$0xff]  }
 0x459   : > { %v1487_v18 = vrot.slane %v1482_v16, 1  ;;  %v1480_v19 = vrot.slane %v1478_v15, 7 }
 0x45a   : > { %2791 = vmatpush3.bf16.msra.mxu1 %v3074_v36 }
 0x45b   : > { %v1488_v20 = vor.u32 %v1487_v18, %v1478_v15  ;;  %v1484_v21 = vor.u32 %v1482_v16, %v1480_v19  ;;  %2792 = vmatprep.subr.bf16.mxu1 %v3076_v38  ;;  %v3102_v15 = vld [vmem:[%s4056_s13 + $0x14] ss:$8 sps:$4 sm:$0xff]   ;;  %v3100_v16 = vld [vmem:[%s4056_s13 + $0x10] ss:$8 sps:$4 sm:$0xff]  }
 0x45d   : > { %v1491_v22 = vsel %vm3371_vm2, %v1488_v20, %v1487_v18  ;;  %v1486_v23 = vsel %vm3387_vm5, %v1480_v19, %v1484_v21  ;;  %v3105_v18 = vld [vmem:[%s4056_s13 + $0x4] ss:$8 sps:$4 sm:$0xff]   ;;  %v3103_v19 = vld [vmem:[%s4056_s13] ss:$8 sps:$4 sm:$0xff]   ;;  %v3108_v20 = vld [vmem:[%s4056_s13 + $0xb4] ss:$8 sps:$4 sm:$0xff]  }
 0x45e   : > { %2635 = vmatprep.mubr.msk.bf16.mxu0 %vm582_vm7, %v1491_v22  ;;  %2793 = vmatpush3.bf16.msra.mxu1 %v3077_v39  ;;  %v3106_v21 = vld [vmem:[%s4056_s13 + $0xb0] ss:$8 sps:$4 sm:$0xff]   ;;  %v3111_v22 = vld [vmem:[%s4056_s13 + $0xa4] ss:$8 sps:$4 sm:$0xff]  }
 0x45f   : > { %2794 = vmatprep.subr.bf16.mxu1 %v3079_v41 }
 0x462   : > { %2795 = vmatpush3.bf16.msra.mxu1 %v3080_v42 }
 0x463   : > { %2120 = vmatprep.subr.bf16.mxu1 %v3084_v5  ;;  %v3129_v5 = vld [vmem:[%s4058_s15 + $0xa0] sm:$0xff]  }
 0x4c9   : > { %v1494_v25 = vpop.permute.xlu1 %1493 }
 0x4ca   : > { %v1497_v26 = vsel %vm582_vm7, %v1486_v23, %v1494_v25  ;;  %v3109_v23 = vld [vmem:[%s4056_s13 + $0xa0] ss:$8 sps:$4 sm:$0xff]   ;;  %v3112_v25 = vld [vmem:[%s4056_s13 + $0x90] ss:$8 sps:$4 sm:$0xff]  }
 0x4cb   : > { %1638 = vmatmul.mubr.bf16.vlgmr.msra.gmra.mxu0 %v1497_v26  ;;  %v3117_v26 = vld [vmem:[%s4056_s13 + $0x84] ss:$8 sps:$4 sm:$0xff]  }
 0x4cc   : > { %2883 = vmatpush3.bf16.msra.mxu0 %v3060_v24  ;;  %2898 = vmatprep.mubr.msk.bf16.mxu0 %vm3208_vm9, %v3207_v34  ;;  %v3114_v24 = vld [vmem:[%s4056_s13 + $0x94] ss:$8 sps:$4 sm:$0xff]  }
 0x4cd   : > { %2884 = vmatprep.subr.bf16.mxu0 %v3207_v34 }
 0x4d0   : > { %2885 = vmatpush3.bf16.msra.mxu0 %v3063_v27  ;;  %v3115_v27 = vld [vmem:[%s4056_s13 + $0x80] ss:$8 sps:$4 sm:$0xff]  }
 0x4d1   : > { %2886 = vmatprep.subr.bf16.mxu0 %v3207_v34 }
 0x4d4   : > { %2887 = vmatpush3.bf16.msra.mxu0 %v3066_v28 }
 0x4d5   : > { %2888 = vmatprep.subr.bf16.mxu0 %v3207_v34 }
 0x4d8   : > { %2889 = vmatpush3.bf16.msra.mxu0 %v3069_v29 }
 0x4d9   : > { %2890 = vmatprep.subr.bf16.mxu0 %v3207_v34 }
 0x4dc   : > { %2891 = vmatpush3.bf16.msra.mxu0 %v3072_v33 }
 0x4dd   : > { %2892 = vmatprep.subr.bf16.mxu0 %v3207_v34 }
 0x4e0   : > { %2893 = vmatpush3.bf16.msra.mxu0 %v3075_v37 }
 0x4e1   : > { %2894 = vmatprep.subr.bf16.mxu0 %v3207_v34 }
 0x4e4   : > { %2895 = vmatpush3.bf16.msra.mxu0 %v3078_v40 }
 0x4e5   : > { %2896 = vmatprep.subr.bf16.mxu0 %v3207_v34 }
 0x4e8   : > { %2897 = vmatpush3.bf16.msra.mxu0 %v3081_v43  ;;  %v3118_v43 = vld [vmem:[%s4058_s15 + $0x78] sm:$0xff]  }
 0x4e9   : > { %2811 = vmatprep.subr.bf16.mxu0 %v3118_v43 }
 0x58b   : > { %v1639_v45 = vpop.f32.mrf.mxu0 }
 0x58c   : > { %v1640_v47 = vadd.f32 %v2622_v44, %v1639_v45  ;;  %v3121_v45 = vld [vmem:[%s4058_s15 + $0x70] sm:$0xff]  }
 0x58d   : > { %v1641_v46 = vpop.f32.mrf.mxu0 }
 0x58e   : > { %v1646_v51 = vmax.f32 %v1640_v47, 0.0  ;;  %v3122_v47 = vld [vmem:[%s4058_s15 + $0x30] sm:$0xff]  }
 0x58f   : > { %v1642_v48 = vpop.f32.mrf.mxu0 }
 0x590   : > { %v1643_v49 = vadd.f32 %v2622_v44, %v1642_v48  ;;  %v3119_v44 = vld [vmem:[%s4058_s15 + $0x38] sm:$0xff]  }
 0x591   : > { %v1644_v50 = vpop.f32.mrf.mxu0 }
 0x592   : > { %v1647_v53 = vmax.f32 %v1643_v49, 0.0  ;;  %v3124_v50 = vld [vmem:[%s4058_s15 + $0x68] sm:$0xff]  }
 0x594   : > { %v1648_v55 = vpack.c.bf16 %v1647_v53, %v1646_v51  ;;  %v3125_v53 = vld [vmem:[%s4058_s15 + $0x28] sm:$0xff]  }
 0x596   : > { %v1650_v60 = vshrl.u32 %v1648_v55, 16  ;;  %v1654_v61 = vshll.u32 %v1648_v55, 16  ;;  %1895 = vmatprep.mubr.bf16.mxu1 %v1648_v55 }
 0x598   : > { %v1652_v62 = vrot.slane %v1650_v60, 7  ;;  %v1659_v63 = vrot.slane %v1654_v61, 1 }
 0x59a   : > { %v1656_v0 = vor.u32 %v1654_v61, %v1652_v62  ;;  %v1660_v1 = vor.u32 %v1659_v63, %v1650_v60  ;;  %v3128_v61 = vld [vmem:[%s4058_s15 + $0x20] sm:$0xff]  }
 0x59c   : > { %v1658_v2 = vsel %vm3387_vm5, %v1652_v62, %v1656_v0  ;;  %v1663_v4 = vsel %vm3371_vm2, %v1660_v1, %v1659_v63  ;;  %v3131_v62 = vld [vmem:[%s4058_s15 + $0x18] sm:$0xff]  }
 0x59d   : > { %1896 = vmatmul.mubr.bf16.vlgmr.msra.gmra.mxu1 %v1658_v2  ;;  %2899 = vmatmul.mubr.bf16.vlgmr.msra.gmra.mxu0 %v1663_v4  ;;  %v3120_v0 = vld [vmem:[%s4058_s15 + $0xb8] sm:$0xff]   ;;  %v3123_v4 = vld [vmem:[%s4058_s15 + $0xb0] sm:$0xff]  }
 0x59e   : > { %2121 = vmatpush1.bf16.msra.mxu1 %v3082_v3  ;;  %2812 = vmatpush3.bf16.msra.mxu0 %v3119_v44  ;;  %v3126_v3 = vld [vmem:[%s4058_s15 + $0xa8] sm:$0xff]  }
 0x59f   : > { %2122 = vmatprep.subr.bf16.mxu1 %v3087_v6  ;;  %2813 = vmatprep.subr.bf16.mxu0 %v3121_v45  ;;  %v3132_v6 = vld [vmem:[%s4058_s15 + $0x98] sm:$0xff]  }
 0x5a2   : > { %2123 = vmatpush1.bf16.msra.mxu1 %v3085_v9  ;;  %2814 = vmatpush3.bf16.msra.mxu0 %v3122_v47  ;;  %v3133_v9 = vld [vmem:[%s4058_s15 + $0x50] sm:$0xff]  }
 0x5a3   : > { %2124 = vmatprep.subr.bf16.mxu1 %v3090_v17  ;;  %2815 = vmatprep.subr.bf16.mxu0 %v3124_v50  ;;  %v3134_v17 = vld [vmem:[%s4058_s15 + $0x10] sm:$0xff]  }
 0x5a6   : > { %2125 = vmatpush1.bf16.msra.mxu1 %v3088_v7  ;;  %2816 = vmatpush3.bf16.msra.mxu0 %v3125_v53  ;;  %v3135_v7 = vld [vmem:[%s4058_s15 + $0x90] sm:$0xff]  }
 0x5a7   : > { %2126 = vmatprep.subr.bf16.mxu1 %v3093_v8  ;;  %2817 = vmatprep.subr.bf16.mxu0 %v3127_v10  ;;  %v3136_v8 = vld [vmem:[%s4058_s15 + $0x48] sm:$0xff]  }
 0x5aa   : > { %2127 = vmatpush1.bf16.msra.mxu1 %v3091_v11  ;;  %2818 = vmatpush3.bf16.msra.mxu0 %v3128_v61  ;;  %v3137_v11 = vld [vmem:[%s4058_s15 + $0x8] sm:$0xff]  }
 0x5ab   : > { %2128 = vmatprep.subr.bf16.mxu1 %v3096_v13  ;;  %v3138_v13 = vld [vmem:[%s4058_s15 + $0x88] sm:$0xff]  }
 0x5ae   : > { %2129 = vmatpush1.bf16.msra.mxu1 %v3094_v58  ;;  %v3139_v58 = vld [vmem:[%s4058_s15 + $0x40] sm:$0xff]  }
 0x5af   : > { %2130 = vmatprep.subr.bf16.mxu1 %v3099_v54  ;;  %v3140_v54 = vld [vmem:[%s4058_s15] sm:$0xff]  }
 0x5b2   : > { %2131 = vmatpush1.bf16.msra.mxu1 %v3097_v59  ;;  %v3141_v59 = vld [vmem:[%s4058_s15 + $0x80] sm:$0xff]  }
 0x5b3   : > { %2132 = vmatprep.subr.bf16.mxu1 %v3102_v15  ;;  %v1986_v15 = vld [vmem:[%s4057_s14] sm:$0x3] }
 0x5b6   : > { %2133 = vmatpush1.bf16.msra.mxu1 %v3100_v16  ;;  %v1991_v16 = vrot.slane %v1986_v15, %v601_v57  ;;  %v2686_v57 = vld [vmem:[%s4059_s16] ss:$0 sm:$0xff] }
 0x5b7   : > { %2134 = vmatprep.subr.bf16.mxu1 %v3105_v18 }
 0x5ba   : > { %2135 = vmatpush1.bf16.msra.mxu1 %v3103_v19 }
 0x5bb   : > { %2144 = vmatprep.subr.bf16.mxu1 %v3108_v20 }
 0x5be   : > { %2145 = vmatpush2.bf16.msra.mxu1 %v3106_v21 }
 0x5bf   : > { %2146 = vmatprep.subr.bf16.mxu1 %v3111_v22 }
 0x5c2   : > { %2147 = vmatpush2.bf16.msra.mxu1 %v3109_v23 }
 0x5c3   : > { %2148 = vmatprep.subr.bf16.mxu1 %v3114_v24 }
 0x5c6   : > { %2149 = vmatpush2.bf16.msra.mxu1 %v3112_v25 }
 0x5c7   : > { %2150 = vmatprep.subr.bf16.mxu1 %v3117_v26 }
 0x5ca   : > { %2151 = vmatpush2.bf16.msra.mxu1 %v3115_v27 }
 0x5cb   : > { %2902 = vmatprep.subr.bf16.mxu1 %v3207_v34 }
 0x65d   : > { %v2796_v28 = vpop.f32.mrf.mxu1  ;;  %v1938_v29 = vpop.f32.mrf.mxu0 }
 0x65f   : > { %v2797_v32 = vpop.f32.mrf.mxu1  ;;  %v2900_v33 = vpop.f32.mrf.mxu0 }
 0x660   : > { %v2798_v35 = vadd.f32 %v2797_v32, %v2796_v28  ;;  %v1995_v33 = vrot.slane %v1986_v15, %v605_v30 }
 0x661   : > { %v2799_v36 = vpop.f32.mrf.mxu1  ;;  %v1941_v37 = vpop.f32.mrf.mxu0 }
 0x662   : > { %v1898_v38 = vadd.f32 %v2798_v35, %v2636_v31 }
 0x663   : > { %v2800_v39 = vpop.f32.mrf.mxu1  ;;  %v2901_v40 = vpop.f32.mrf.mxu0 }
 0x664   : > { %v1939_v41 = vadd.f32 %v1938_v29, %v1898_v38  ;;  %v2801_v42 = vadd.f32 %v2800_v39, %v2799_v36 }
 0x666   : > { %v1901_v46 = vadd.f32 %v2801_v42, %v2636_v31  ;;  %v1945_v49 = vadd.f32 %v1939_v41, %v1474_v14 }
 0x668   : > { %v1942_v48 = vadd.f32 %v1941_v37, %v1901_v46  ;;  %v1947_v55 = vmax.f32 %v1945_v49, 0.0 }
 0x66a   : > { %v1946_v51 = vadd.f32 %v1942_v48, %v1475_v52  ;;  %v3130_v52 = vld [vmem:[%s4058_s15 + $0x58] sm:$0xff]  }
 0x66b   : > { %2819 = vmatprep.subr.bf16.mxu0 %v3130_v52 }
 0x66c   : > { %v1948_v60 = vmax.f32 %v1946_v51, 0.0  ;;  %2820 = vmatpush3.bf16.msra.mxu0 %v3131_v62 }
 0x66d   : > { %2821 = vmatprep.subr.bf16.mxu0 %v3133_v9 }
 0x66e   : > { %v1949_v14 = vpack.c.bf16 %v1948_v60, %v1947_v55 }
 0x670   : > { %1957 = vrot.lane.b32.xlu0 %v1949_v14, %s3206_s29  ;;  %v1954_v12 = vrot.slane %v1949_v14, 1  ;;  %v1951_v63 = vrot.slane %v1949_v14, 7  ;;  %2822 = vmatpush3.bf16.msra.mxu0 %v3134_v17 }
 0x671   : > { %2823 = vmatprep.subr.bf16.mxu0 %v3136_v8 }
 0x672   : > { %2685 = vmatprep.mubr.msk.bf16.mxu1 %vm582_vm7, %v1954_v12 }
 0x674   : > { %2824 = vmatpush3.bf16.msra.mxu0 %v3137_v11 }
 0x675   : > { %2825 = vmatprep.subr.bf16.mxu0 %v3139_v58 }
 0x678   : > { %2826 = vmatpush3.bf16.msra.mxu0 %v3140_v54 }
 0x6e2   : > { %v1958_v1 = vpop.permute.xlu0 %1957 }
 0x6e3   : > { %v1960_v2 = vsel %vm582_vm7, %v1951_v63, %v1958_v1 }
 0x6e4   : > { %2153 = vmatmul.mubr.bf16.vlgmr.msra.gmra.mxu1 %v1960_v2 }
 0x6e5   : > { %2903 = vmatpush3.bf16.msra.mxu1 %v3120_v0  ;;  %2918 = vmatprep.mubr.msk.bf16.mxu1 %vm3208_vm9, %v3207_v34 }
 0x6e6   : > { %2904 = vmatprep.subr.bf16.mxu1 %v3207_v34 }
 0x6e9   : > { %2905 = vmatpush3.bf16.msra.mxu1 %v3123_v4 }
 0x6ea   : > { %2906 = vmatprep.subr.bf16.mxu1 %v3207_v34 }
 0x6ed   : > { %2907 = vmatpush3.bf16.msra.mxu1 %v3126_v3 }
 0x6ee   : > { %2908 = vmatprep.subr.bf16.mxu1 %v3207_v34 }
 0x6f1   : > { %2909 = vmatpush3.bf16.msra.mxu1 %v3129_v5 }
 0x6f2   : > { %2910 = vmatprep.subr.bf16.mxu1 %v3207_v34 }
 0x6f5   : > { %2911 = vmatpush3.bf16.msra.mxu1 %v3132_v6 }
 0x6f6   : > { %2912 = vmatprep.subr.bf16.mxu1 %v3207_v34 }
 0x6f9   : > { %2913 = vmatpush3.bf16.msra.mxu1 %v3135_v7 }
 0x6fa   : > { %2914 = vmatprep.subr.bf16.mxu1 %v3207_v34 }
 0x6fd   : > { %2915 = vmatpush3.bf16.msra.mxu1 %v3138_v13 }
 0x6fe   : > { %2916 = vmatprep.subr.bf16.mxu1 %v3207_v34 }
 0x701   : > { %2917 = vmatpush3.bf16.msra.mxu1 %v3141_v59 }
 0x7a4   : > { %v2154_v18 = vpop.f32.mrf.mxu1 }
 0x7a5   : > { %v2155_v19 = vadd.f32 %v2154_v18, %v1991_v16 }
 0x7a6   : > { %v2156_v34 = vpop.f32.mrf.mxu1 }
 0x7a7   : > { %v2163_v22 = vmax.f32 %v2155_v19, 0.0  ;;  %v2157_v41 = vadd.f32 %v2156_v34, %v1995_v33 }
 0x7a8   : > { %v2158_v20 = vpop.f32.mrf.mxu1 }
 0x7a9   : > { %v2159_v21 = vadd.f32 %v2158_v20, %v1991_v16 }
 0x7aa   : > { %v2160_v27 = vpop.f32.mrf.mxu1 }
 0x7ab   : > { %v2164_v23 = vmax.f32 %v2159_v21, 0.0  ;;  %v2161_v46 = vadd.f32 %v2160_v27, %v1995_v33 }
 0x7ad   : > { %v2165_v24 = vpack.c.bf16 %v2164_v23, %v2163_v22 }
 0x7af   : > { %2406 = vmatprep.mubr.bf16.mxu0 %v2165_v24  ;;  %v2167_v25 = vrot.slane %v2165_v24, 7  ;;  %v2171_v26 = vrot.slane %v2165_v24, 1 }
 0x7b1   : > { %2407 = vmatmul.mubr.bf16.vlgmr.msra.gmra.mxu0 %v2167_v25  ;;  %2919 = vmatmul.mubr.bf16.vlgmr.msra.gmra.mxu1 %v2171_v26 }
 0x871   : > { %v2827_v28 = vpop.f32.mrf.mxu0  ;;  %v2449_v29 = vpop.f32.mrf.mxu1 }
 0x873   : > { %v2828_v31 = vpop.f32.mrf.mxu0  ;;  %v2920_v32 = vpop.f32.mrf.mxu1 }
 0x874   : > { %v2829_v35 = vadd.f32 %v2828_v31, %v2827_v28 }
 0x875   : > { %v2830_v36 = vpop.f32.mrf.mxu0  ;;  %v2452_v37 = vpop.f32.mrf.mxu1 }
 0x876   : > { %v2409_v38 = vadd.f32 %v2829_v35, %v2686_v57 }
 0x877   : > { %v2831_v39 = vpop.f32.mrf.mxu0  ;;  %v2921_v40 = vpop.f32.mrf.mxu1 }
 0x878   : > { %v2450_v42 = vadd.f32 %v2449_v29, %v2409_v38  ;;  %v2832_v43 = vadd.f32 %v2831_v39, %v2830_v36 }
 0x87a   : > { %v2456_v44 = vadd.f32 %v2450_v42, %v2157_v41  ;;  %v2412_v45 = vadd.f32 %v2832_v43, %v2686_v57 }
 0x87c   : > { %v2458_v47 = vmax.f32 %v2456_v44, 0.0  ;;  %v2453_v48 = vadd.f32 %v2452_v37, %v2412_v45 }
 0x87e   : > { %2460 = vst [vmem:[%s541_s18] sm:$0xff] %v2458_v47  ;;  %v2457_v56 = vadd.f32 %v2453_v48, %v2161_v46 }
 0x880   : > { %v2459_v30 = vmax.f32 %v2457_v56, 0.0 }
 0x882   : > { %2461 = vst [vmem:[%s541_s18 + $0x8] sm:$0xff] %v2459_v30 }
 0x883   : > { %3155 = shalt.err (!%p3152_p3)
}
 0x884   : > { %s3156_s21 = scalar_lea.hbm %s3999_s0, 256  ;;  %s3160_s29 = scalar_lea.hbm %s4089_s17, 512 }
 0x885   : > { %p3157_p4 = scmp.ne.s32.totalorder %s3999_s0, %s3156_s21  ;;  %p3161_p9 = scmp.lt.s32.totalorder %s3999_s0, %s4089_s17 }
 0x886   : > { %p3162_p10 = scmp.lt.s32.totalorder %s3160_s29, %s3156_s21 }
 0x887   : > { %p3158_p7 = pnand %p3157_p4, %p3340_p5 }
 0x888   : > { %p3163_p11 = por %p3162_p10, %p3161_p9 }
 0x889   : > { %p3159_p8 = pneg %p3158_p7 }
 0x88b   : > { %p3164_p12 = pnand %p3163_p11, %p3159_p8 }
 0x88d   : > { %3167 = shalt.err (!%p3164_p12)
}
 0x88e   : > { %s3210_s20 = smov 128   ;;  %s3211_s22 = smov 8  }
 0x88f   : > { %2922 = dma.vmem_to_hbm [thread:$0]  (%p3340_p5), %s4001_s24, 256, %s3999_s0, %s4003_s19, %s3210_s20, %s3210_s20, %s3211_s22  }
 0x890 PF: > { %s4090_s26 = sld [smem:[#allocation7_spill]] }
 0x891   : > { %s4091_s30 = sld [smem:[#allocation5_spill]] }
 0x896   : > { %p2928_p13 = scmp.ge.s32.totalorder %s4090_s26, 2 }
 0x897   : > { %s2491_s2 = sand.u32 1, %s4091_s30  }
 0x898   : > { %p2925_p0 = pnand %p2928_p13, %p3344_p6  ;;  %s2492_s21 = scalar_lea.sflag [#allocation3], %s2491_s2 }
 0x89a   : > { %p2926_p1 = pneg %p2925_p0 }
 0x89c   : > { %3185 = dma.done.wait (%p2926_p1), %s2492_s21, 256  }
 0x89d   : > { %3187 = vsyncadd (%p2926_p1), %s2492_s21, 4294967040  ;;  %s4093_s27 = sld [smem:[#allocation8_spill]]  ;;  %s4096_s24 = smov %s3194_s25 }
 0x89e   : > { %s4094_s29 = sld [smem:[#allocation6_spill]] }
 0x89f   : > { %s4095_s26 = sld [smem:[#allocation9_spill]] }
 0x8a3   : > { %p27_p2 = scmp.ge.s32.totalorder %s4093_s27, 4  }
 0x8a4   : > { %s4097_s25 = smov %s4094_s29 }
 0x8a5   :  { %29 = sbr.rel (!%p27_p2) target bundleno = 8 (0x8), region = 123 }
 0x8aa   :  { %2497 = vsyncpa [#allocation3], 1 }
 0x8ab   :  { %2499 = vsyncpa [#allocation3 + $0x1], 1 }

</bundles_post_ra>
